<compile_context>
chip_gen: v6e
topology: v6e:2x2x1
jax: 0.10.0
libtpu: 0.0.40
codegen_flags: <defaults>
</compile_context>

<pallas_src>
import functools
import math

import jax
import jax.numpy as jnp
from jax import lax
from jax.experimental import pallas as pl
from jax.experimental.pallas import tpu as pltpu  # noqa: F401  (kept for prod tiling TODO)


# -----------------------------------------------------------------------------
# Torch-style custom LayerNorm from the module: unbiased std (divide by N-1),
# eps added to std (not to var).
# -----------------------------------------------------------------------------

def _layernorm_f32(x, gamma, beta, feat, eps):
    mean = jnp.mean(x, axis=-1, keepdims=True)
    diff = x - mean
    var = jnp.sum(diff * diff, axis=-1, keepdims=True) * (1.0 / (feat - 1))
    std = jnp.sqrt(var)
    return gamma * diff / (std + eps) + beta


# -----------------------------------------------------------------------------
# Fused whole-network kernel
# -----------------------------------------------------------------------------

def _transformer_kernel(x_ref,
                        ng_ref, nb_ref,
                        ln0g_ref, ln0b_ref,
                        wqkv_ref, bqkv_ref,
                        wo_ref, bo_ref,
                        ln1g_ref, ln1b_ref,
                        w1_ref, b1_ref,
                        w2_ref, b2_ref,
                        o_ref,
                        *, n_block, n_head, d_k, d_model, batch, seq,
                        eps, mxu_dtype):
    """Top-level LN + n_block AttnBlocks on the flattened (B*S, D) slab."""
    f32 = jnp.float32
    scale = 1.0 / math.sqrt(d_k)

    def mm(a_f32, w, b):
        # bf16 (or f32) MXU operands, f32 accumulate, f32 bias add on the VPU.
        y = jnp.dot(a_f32.astype(mxu_dtype), w.astype(mxu_dtype),
                    preferred_element_type=f32)
        return y + b.astype(f32)

    x = x_ref[...].astype(f32)                                   # (B*S, D)

    # ---- top-level LayerNorm (fused; previously a separate pallas_call) ----
    x = _layernorm_f32(x, ng_ref[...].astype(f32), nb_ref[...].astype(f32),
                       d_model, eps)

    for l in range(n_block):                                     # static unroll
        # ---- sublayer 0: x + Wo( attn( LN0(x) ) ) --------------------------
        h = _layernorm_f32(x, ln0g_ref[l].astype(f32), ln0b_ref[l].astype(f32),
                           d_model, eps)
        qkv = mm(h, wqkv_ref[l], bqkv_ref[l])                    # (B*S, 3D) lane-dense
        q = qkv[:, 0:d_model]
        k = qkv[:, d_model:2 * d_model]
        v = qkv[:, 2 * d_model:3 * d_model]

        attn_rows = []
        for b in range(batch):                                   # static (B small)
            rs = slice(b * seq, (b + 1) * seq)
            qb, kb, vb = q[rs], k[rs], v[rs]                     # (S, D)

            # Pack per-head scores on the sublane axis -> one softmax pass.
            s_parts = []
            for hd in range(n_head):
                cs = slice(hd * d_k, (hd + 1) * d_k)
                # scores: contract over d_k of both operands (transposed-RHS
                # MXU push, no explicit k.T)
                s_parts.append(lax.dot_general(
                    qb[:, cs].astype(mxu_dtype), kb[:, cs].astype(mxu_dtype),
                    (((1,), (1,)), ((), ())),
                    preferred_element_type=f32))                 # (S, S)
            s = jnp.concatenate(s_parts, axis=0) * scale         # (H*S, S)
            s = s - jnp.max(s, axis=-1, keepdims=True)           # f32 softmax
            p = jnp.exp(s)
            p = p / jnp.sum(p, axis=-1, keepdims=True)           # exact divide

            # Per-head P @ V; lane-concat implements the head concat with no
            # transposes; Wo is applied once below on the full (B*S, D) slab.
            o_parts = []
            for hd in range(n_head):
                cs = slice(hd * d_k, (hd + 1) * d_k)
                ph = p[hd * seq:(hd + 1) * seq, :]
                o_parts.append(jnp.dot(ph.astype(mxu_dtype),
                                       vb[:, cs].astype(mxu_dtype),
                                       preferred_element_type=f32))
            attn_rows.append(jnp.concatenate(o_parts, axis=1))   # (S, D)

        attn = jnp.concatenate(attn_rows, axis=0)                # (B*S, D)
        x = x + mm(attn, wo_ref[l], bo_ref[l])                   # single Wo matmul + residual

        # ---- sublayer 1: x + FFN( LN1(x) ) ---------------------------------
        h1 = _layernorm_f32(x, ln1g_ref[l].astype(f32), ln1b_ref[l].astype(f32),
                            d_model, eps)
        ff = jnp.maximum(mm(h1, w1_ref[l], b1_ref[l]), 0.0)      # ReLU in f32 (VPU)
        x = x + mm(ff, w2_ref[l], b2_ref[l])                     # fused residual

    o_ref[...] = x.astype(o_ref.dtype)


# -----------------------------------------------------------------------------
# Wrapper: one pallas_call for the whole network
# -----------------------------------------------------------------------------

def transformer_forward(x, params, n_head, eps=1e-6, mxu_dtype=jnp.bfloat16):
    B, S, D = x.shape
    L = params["Wqkv"].shape[0]
    d_k = D // n_head

    kern = functools.partial(_transformer_kernel, n_block=L, n_head=n_head,
                             d_k=d_k, d_model=D, batch=B, seq=S, eps=eps,
                             mxu_dtype=mxu_dtype)
    out = pl.pallas_call(
        kern,
        out_shape=jax.ShapeDtypeStruct((B * S, D), x.dtype),
        # No grid / BlockSpecs: whole arrays are resident in VMEM (tiny here).
    )(x.reshape(B * S, D),
      params["norm_g"].reshape(1, D), params["norm_b"].reshape(1, D),
      params["ln0_g"], params["ln0_b"],
      params["Wqkv"], params["bqkv"],
      params["Wo"], params["bo"],
      params["ln1_g"], params["ln1_b"],
      params["W1"], params["b1"],
      params["W2"], params["b2"])
    return out.reshape(B, S, D)


# -----------------------------------------------------------------------------
# Pure-JAX reference (mirrors the PyTorch module, eval mode, mask=None)
# -----------------------------------------------------------------------------

def transformer_reference(x, params, n_head, eps=1e-6):
    def ln(x, g, b):
        mean = x.mean(-1, keepdims=True)
        diff = x - mean
        var = (diff * diff).sum(-1, keepdims=True) / (x.shape[-1] - 1)
        std = jnp.sqrt(var)
        return g * diff / (std + eps) + b

    B, S, D = x.shape
    d_k = D // n_head
    x = ln(x, params["norm_g"], params["norm_b"])
    L = params["Wqkv"].shape[0]
    for l in range(L):
        h = ln(x, params["ln0_g"][l, 0], params["ln0_b"][l, 0])
        qkv = h @ params["Wqkv"][l] + params["bqkv"][l, 0]
        q, k, v = jnp.split(qkv, 3, axis=-1)
        def heads(t):
            return t.reshape(B, S, n_head, d_k).transpose(0, 2, 1, 3)
        qh, kh, vh = heads(q), heads(k), heads(v)
        s = jnp.einsum("bhqd,bhkd->bhqk", qh, kh) / math.sqrt(d_k)
        p = jax.nn.softmax(s, axis=-1)
        o = jnp.einsum("bhqk,bhkd->bhqd", p, vh)
        o = o.transpose(0, 2, 1, 3).reshape(B, S, D)
        x = x + (o @ params["Wo"][l] + params["bo"][l, 0])
        h1 = ln(x, params["ln1_g"][l, 0], params["ln1_b"][l, 0])
        ff = jnp.maximum(h1 @ params["W1"][l] + params["b1"][l, 0], 0.0)
        x = x + (ff @ params["W2"][l] + params["b2"][l, 0])
    return x


# -----------------------------------------------------------------------------
# Deterministic parameter init (mimics nn.Linear default U(-1/sqrt(fan_in), ..))
# with per-layer weights stacked on a leading layer axis.
# -----------------------------------------------------------------------------

def _init_linear(key, fan_in, fan_out, dtype=jnp.float32):
    kw, kb = jax.random.split(key)
    bound = 1.0 / math.sqrt(fan_in)
    w = jax.random.uniform(kw, (fan_in, fan_out), dtype, -bound, bound)
    b = jax.random.uniform(kb, (fan_out,), dtype, -bound, bound)
    return w, b


def init_params(key, d_model, dim_ff, n_block, dtype=jnp.float32):
    Wqkv, bqkv, Wo, bo, W1, b1, W2, b2 = ([] for _ in range(8))
    for _ in range(n_block):
        keys = jax.random.split(key, 7)
        key = keys[0]
        wq, bq_ = _init_linear(keys[1], d_model, d_model, dtype)
        wk, bk_ = _init_linear(keys[2], d_model, d_model, dtype)
        wv, bv_ = _init_linear(keys[3], d_model, d_model, dtype)
        wo_, bo_ = _init_linear(keys[4], d_model, d_model, dtype)
        w1_, b1_ = _init_linear(keys[5], d_model, dim_ff, dtype)
        w2_, b2_ = _init_linear(keys[6], dim_ff, d_model, dtype)
        # QKV merged into one lane-dense (D, 3D) weight: [Wq | Wk | Wv]
        Wqkv.append(jnp.concatenate([wq, wk, wv], axis=1))
        bqkv.append(jnp.concatenate([bq_, bk_, bv_], axis=0).reshape(1, 3 * d_model))
        Wo.append(wo_); bo.append(bo_.reshape(1, d_model))
        W1.append(w1_); b1.append(b1_.reshape(1, dim_ff))
        W2.append(w2_); b2.append(b2_.reshape(1, d_model))
    return {
        "norm_g": jnp.ones((d_model,), dtype),
        "norm_b": jnp.zeros((d_model,), dtype),
        "Wqkv": jnp.stack(Wqkv), "bqkv": jnp.stack(bqkv),
        "Wo": jnp.stack(Wo), "bo": jnp.stack(bo),
        "W1": jnp.stack(W1), "b1": jnp.stack(b1),
        "W2": jnp.stack(W2), "b2": jnp.stack(b2),
        "ln0_g": jnp.ones((n_block, 1, d_model), dtype),
        "ln0_b": jnp.zeros((n_block, 1, d_model), dtype),
        "ln1_g": jnp.ones((n_block, 1, d_model), dtype),
        "ln1_b": jnp.zeros((n_block, 1, d_model), dtype),
    }


# -----------------------------------------------------------------------------
# Main
# -----------------------------------------------------------------------------

if __name__ == "__main__":
    B, S = 2, 8                 # batch, sequence length
    n_embs = 32                 # d_model
    dim_ff = 64
    n_head = 4
    n_block = 2
    # dropout = 0.1 in the PyTorch module -> identity here (eval mode).

    key = jax.random.PRNGKey(0)
    kx, kp = jax.random.split(key)
    x = jax.random.normal(kx, (B, S, n_embs), jnp.float32)
    params = init_params(kp, n_embs, dim_ff, n_block)

    # bf16 MXU operands (f32 accumulation, f32 LN/softmax) for peak MXU
    # throughput on v5e/v6e/v7x; pass mxu_dtype=jnp.float32 for tightest
    # numerical parity with the PyTorch module.
    fwd = jax.jit(functools.partial(transformer_forward, n_head=n_head,
                                    mxu_dtype=jnp.bfloat16))
    out = jax.block_until_ready(fwd(x, params))
    assert out.shape == (B, S, n_embs) and out.dtype == jnp.float32

    # Sanity check against the pure-JAX reference (bf16 MXU -> loose tolerance).
    ref = transformer_reference(x, params, n_head)
    err = float(jnp.max(jnp.abs(out - ref)) / (jnp.max(jnp.abs(ref)) + 1e-6))
    assert err < 0.05, f"mismatch vs reference: rel-max-err={err}"

    print("KERNEL_OK")
</pallas_src>

<mosaic_0001>
module attributes {stable_mosaic.version = 11 : i64} {
  func.func @_transformer_kernel(%arg0: memref<16x32xf32, #tpu.memory_space<vmem>>, %arg1: memref<1x32xf32, #tpu.memory_space<vmem>>, %arg2: memref<1x32xf32, #tpu.memory_space<vmem>>, %arg3: memref<2x1x32xf32, #tpu.memory_space<vmem>>, %arg4: memref<2x1x32xf32, #tpu.memory_space<vmem>>, %arg5: memref<2x32x96xf32, #tpu.memory_space<vmem>>, %arg6: memref<2x1x96xf32, #tpu.memory_space<vmem>>, %arg7: memref<2x32x32xf32, #tpu.memory_space<vmem>>, %arg8: memref<2x1x32xf32, #tpu.memory_space<vmem>>, %arg9: memref<2x1x32xf32, #tpu.memory_space<vmem>>, %arg10: memref<2x1x32xf32, #tpu.memory_space<vmem>>, %arg11: memref<2x32x64xf32, #tpu.memory_space<vmem>>, %arg12: memref<2x1x64xf32, #tpu.memory_space<vmem>>, %arg13: memref<2x64x32xf32, #tpu.memory_space<vmem>>, %arg14: memref<2x1x32xf32, #tpu.memory_space<vmem>>, %arg15: memref<16x32xf32, #tpu.memory_space<vmem>>) attributes {dimension_semantics = [], scalar_prefetch = 0 : i64, scratch_operands = 0 : i64, tpu.core_type = #tpu.core_type<tc>} {
    %c0 = arith.constant 0 : index
    %c0_0 = arith.constant 0 : index
    %0 = vector.load %arg0[%c0, %c0_0] : memref<16x32xf32, #tpu.memory_space<vmem>>, vector<16x32xf32>
    %c0_1 = arith.constant 0 : index
    %c0_2 = arith.constant 0 : index
    %1 = vector.load %arg1[%c0_1, %c0_2] : memref<1x32xf32, #tpu.memory_space<vmem>>, vector<1x32xf32>
    %c0_3 = arith.constant 0 : index
    %c0_4 = arith.constant 0 : index
    %2 = vector.load %arg2[%c0_3, %c0_4] : memref<1x32xf32, #tpu.memory_space<vmem>>, vector<1x32xf32>
    %cst = arith.constant dense<0.000000e+00> : vector<16xf32>
    %3 = vector.multi_reduction <add>, %0, %cst [1] : vector<16x32xf32> to vector<16xf32>
    %4 = vector.shape_cast %3 : vector<16xf32> to vector<16x1xf32>
    %cst_5 = arith.constant 3.200000e+01 : f32
    %5 = vector.broadcast %cst_5 : f32 to vector<16x1xf32>
    %6 = arith.divf %4, %5 : vector<16x1xf32>
    %7 = vector.broadcast %6 : vector<16x1xf32> to vector<16x32xf32>
    %8 = arith.subf %0, %7 : vector<16x32xf32>
    %9 = arith.mulf %8, %8 : vector<16x32xf32>
    %cst_6 = arith.constant dense<0.000000e+00> : vector<16xf32>
    %10 = vector.multi_reduction <add>, %9, %cst_6 [1] : vector<16x32xf32> to vector<16xf32>
    %11 = vector.shape_cast %10 : vector<16xf32> to vector<16x1xf32>
    %cst_7 = arith.constant 0.0322580636 : f32
    %12 = vector.broadcast %cst_7 : f32 to vector<16x1xf32>
    %13 = arith.mulf %11, %12 : vector<16x1xf32>
    %14 = math.sqrt %13 : vector<16x1xf32>
    %15 = vector.broadcast %1 : vector<1x32xf32> to vector<16x32xf32>
    %16 = arith.mulf %15, %8 : vector<16x32xf32>
    %cst_8 = arith.constant 9.99999997E-7 : f32
    %17 = vector.broadcast %cst_8 : f32 to vector<16x1xf32>
    %18 = arith.addf %14, %17 : vector<16x1xf32>
    %19 = vector.broadcast %18 : vector<16x1xf32> to vector<16x32xf32>
    %20 = arith.divf %16, %19 : vector<16x32xf32>
    %21 = vector.broadcast %2 : vector<1x32xf32> to vector<16x32xf32>
    %22 = arith.addf %20, %21 : vector<16x32xf32>
    %c0_9 = arith.constant 0 : index
    %c0_10 = arith.constant 0 : index
    %c0_11 = arith.constant 0 : index
    %23 = vector.load %arg3[%c0_9, %c0_10, %c0_11] : memref<2x1x32xf32, #tpu.memory_space<vmem>>, vector<1x1x32xf32>
    %24 = vector.shape_cast %23 : vector<1x1x32xf32> to vector<1x32xf32>
    %c0_12 = arith.constant 0 : index
    %c0_13 = arith.constant 0 : index
    %c0_14 = arith.constant 0 : index
    %25 = vector.load %arg4[%c0_12, %c0_13, %c0_14] : memref<2x1x32xf32, #tpu.memory_space<vmem>>, vector<1x1x32xf32>
    %26 = vector.shape_cast %25 : vector<1x1x32xf32> to vector<1x32xf32>
    %cst_15 = arith.constant dense<0.000000e+00> : vector<16xf32>
    %27 = vector.multi_reduction <add>, %22, %cst_15 [1] : vector<16x32xf32> to vector<16xf32>
    %28 = vector.shape_cast %27 : vector<16xf32> to vector<16x1xf32>
    %cst_16 = arith.constant 3.200000e+01 : f32
    %29 = vector.broadcast %cst_16 : f32 to vector<16x1xf32>
    %30 = arith.divf %28, %29 : vector<16x1xf32>
    %31 = vector.broadcast %30 : vector<16x1xf32> to vector<16x32xf32>
    %32 = arith.subf %22, %31 : vector<16x32xf32>
    %33 = arith.mulf %32, %32 : vector<16x32xf32>
    %cst_17 = arith.constant dense<0.000000e+00> : vector<16xf32>
    %34 = vector.multi_reduction <add>, %33, %cst_17 [1] : vector<16x32xf32> to vector<16xf32>
    %35 = vector.shape_cast %34 : vector<16xf32> to vector<16x1xf32>
    %cst_18 = arith.constant 0.0322580636 : f32
    %36 = vector.broadcast %cst_18 : f32 to vector<16x1xf32>
    %37 = arith.mulf %35, %36 : vector<16x1xf32>
    %38 = math.sqrt %37 : vector<16x1xf32>
    %39 = vector.broadcast %24 : vector<1x32xf32> to vector<16x32xf32>
    %40 = arith.mulf %39, %32 : vector<16x32xf32>
    %cst_19 = arith.constant 9.99999997E-7 : f32
    %41 = vector.broadcast %cst_19 : f32 to vector<16x1xf32>
    %42 = arith.addf %38, %41 : vector<16x1xf32>
    %43 = vector.broadcast %42 : vector<16x1xf32> to vector<16x32xf32>
    %44 = arith.divf %40, %43 : vector<16x32xf32>
    %45 = vector.broadcast %26 : vector<1x32xf32> to vector<16x32xf32>
    %46 = arith.addf %44, %45 : vector<16x32xf32>
    %c0_20 = arith.constant 0 : index
    %c0_21 = arith.constant 0 : index
    %c0_22 = arith.constant 0 : index
    %47 = vector.load %arg5[%c0_20, %c0_21, %c0_22] : memref<2x32x96xf32, #tpu.memory_space<vmem>>, vector<1x32x96xf32>
    %48 = vector.shape_cast %47 : vector<1x32x96xf32> to vector<32x96xf32>
    %c0_23 = arith.constant 0 : index
    %c0_24 = arith.constant 0 : index
    %c0_25 = arith.constant 0 : index
    %49 = vector.load %arg6[%c0_23, %c0_24, %c0_25] : memref<2x1x96xf32, #tpu.memory_space<vmem>>, vector<1x1x96xf32>
    %50 = vector.shape_cast %49 : vector<1x1x96xf32> to vector<1x96xf32>
    %51 = arith.truncf %46 : vector<16x32xf32> to vector<16x32xbf16>
    %52 = arith.truncf %48 : vector<32x96xf32> to vector<32x96xbf16>
    %cst_26 = arith.constant dense<0.000000e+00> : vector<16x96xf32>
    %53 = tpu.matmul %51, %52, %cst_26 {dimension_numbers = #tpu.dot_dimension_numbers<[1], [0], [0], [1], [0, 0, 1, 1], [], []>} : vector<16x32xbf16>, vector<32x96xbf16>, vector<16x96xf32> -> vector<16x96xf32>
    %54 = vector.broadcast %50 : vector<1x96xf32> to vector<16x96xf32>
    %55 = arith.addf %53, %54 : vector<16x96xf32>
    %56 = vector.extract_strided_slice %55 {offsets = [0, 0], sizes = [16, 32], strides = [1, 1]} : vector<16x96xf32> to vector<16x32xf32>
    %57 = vector.extract_strided_slice %55 {offsets = [0, 32], sizes = [16, 32], strides = [1, 1]} : vector<16x96xf32> to vector<16x32xf32>
    %58 = vector.extract_strided_slice %55 {offsets = [0, 64], sizes = [16, 32], strides = [1, 1]} : vector<16x96xf32> to vector<16x32xf32>
    %59 = vector.extract_strided_slice %56 {offsets = [0, 0], sizes = [8, 32], strides = [1, 1]} : vector<16x32xf32> to vector<8x32xf32>
    %60 = vector.extract_strided_slice %57 {offsets = [0, 0], sizes = [8, 32], strides = [1, 1]} : vector<16x32xf32> to vector<8x32xf32>
    %61 = vector.extract_strided_slice %58 {offsets = [0, 0], sizes = [8, 32], strides = [1, 1]} : vector<16x32xf32> to vector<8x32xf32>
    %62 = vector.extract_strided_slice %59 {offsets = [0, 0], sizes = [8, 8], strides = [1, 1]} : vector<8x32xf32> to vector<8x8xf32>
    %63 = arith.truncf %62 : vector<8x8xf32> to vector<8x8xbf16>
    %64 = vector.extract_strided_slice %60 {offsets = [0, 0], sizes = [8, 8], strides = [1, 1]} : vector<8x32xf32> to vector<8x8xf32>
    %65 = arith.truncf %64 : vector<8x8xf32> to vector<8x8xbf16>
    %cst_27 = arith.constant dense<0.000000e+00> : vector<8x8xf32>
    %66 = tpu.matmul %63, %65, %cst_27 {dimension_numbers = #tpu.dot_dimension_numbers<[1], [1], [0], [0], [0, 0, 1, 0], [], []>} : vector<8x8xbf16>, vector<8x8xbf16>, vector<8x8xf32> -> vector<8x8xf32>
    %67 = vector.extract_strided_slice %59 {offsets = [0, 8], sizes = [8, 8], strides = [1, 1]} : vector<8x32xf32> to vector<8x8xf32>
    %68 = arith.truncf %67 : vector<8x8xf32> to vector<8x8xbf16>
    %69 = vector.extract_strided_slice %60 {offsets = [0, 8], sizes = [8, 8], strides = [1, 1]} : vector<8x32xf32> to vector<8x8xf32>
    %70 = arith.truncf %69 : vector<8x8xf32> to vector<8x8xbf16>
    %cst_28 = arith.constant dense<0.000000e+00> : vector<8x8xf32>
    %71 = tpu.matmul %68, %70, %cst_28 {dimension_numbers = #tpu.dot_dimension_numbers<[1], [1], [0], [0], [0, 0, 1, 0], [], []>} : vector<8x8xbf16>, vector<8x8xbf16>, vector<8x8xf32> -> vector<8x8xf32>
    %72 = vector.extract_strided_slice %59 {offsets = [0, 16], sizes = [8, 8], strides = [1, 1]} : vector<8x32xf32> to vector<8x8xf32>
    %73 = arith.truncf %72 : vector<8x8xf32> to vector<8x8xbf16>
    %74 = vector.extract_strided_slice %60 {offsets = [0, 16], sizes = [8, 8], strides = [1, 1]} : vector<8x32xf32> to vector<8x8xf32>
    %75 = arith.truncf %74 : vector<8x8xf32> to vector<8x8xbf16>
    %cst_29 = arith.constant dense<0.000000e+00> : vector<8x8xf32>
    %76 = tpu.matmul %73, %75, %cst_29 {dimension_numbers = #tpu.dot_dimension_numbers<[1], [1], [0], [0], [0, 0, 1, 0], [], []>} : vector<8x8xbf16>, vector<8x8xbf16>, vector<8x8xf32> -> vector<8x8xf32>
    %77 = vector.extract_strided_slice %59 {offsets = [0, 24], sizes = [8, 8], strides = [1, 1]} : vector<8x32xf32> to vector<8x8xf32>
    %78 = arith.truncf %77 : vector<8x8xf32> to vector<8x8xbf16>
    %79 = vector.extract_strided_slice %60 {offsets = [0, 24], sizes = [8, 8], strides = [1, 1]} : vector<8x32xf32> to vector<8x8xf32>
    %80 = arith.truncf %79 : vector<8x8xf32> to vector<8x8xbf16>
    %cst_30 = arith.constant dense<0.000000e+00> : vector<8x8xf32>
    %81 = tpu.matmul %78, %80, %cst_30 {dimension_numbers = #tpu.dot_dimension_numbers<[1], [1], [0], [0], [0, 0, 1, 0], [], []>} : vector<8x8xbf16>, vector<8x8xbf16>, vector<8x8xf32> -> vector<8x8xf32>
    %82 = tpu.concatenate %66, %71, %76, %81 in 0 : vector<8x8xf32>, vector<8x8xf32>, vector<8x8xf32>, vector<8x8xf32> -> vector<32x8xf32>
    %cst_31 = arith.constant 0.353553385 : f32
    %83 = vector.broadcast %cst_31 : f32 to vector<32x8xf32>
    %84 = arith.mulf %82, %83 : vector<32x8xf32>
    %cst_32 = arith.constant dense<0xFF800000> : vector<32xf32>
    %85 = vector.multi_reduction <maximumf>, %84, %cst_32 [1] : vector<32x8xf32> to vector<32xf32>
    %86 = vector.shape_cast %85 : vector<32xf32> to vector<32x1xf32>
    %87 = vector.broadcast %86 : vector<32x1xf32> to vector<32x8xf32>
    %88 = arith.subf %84, %87 : vector<32x8xf32>
    %89 = math.exp %88 : vector<32x8xf32>
    %cst_33 = arith.constant dense<0.000000e+00> : vector<32xf32>
    %90 = vector.multi_reduction <add>, %89, %cst_33 [1] : vector<32x8xf32> to vector<32xf32>
    %91 = vector.shape_cast %90 : vector<32xf32> to vector<32x1xf32>
    %92 = vector.broadcast %91 : vector<32x1xf32> to vector<32x8xf32>
    %93 = arith.divf %89, %92 : vector<32x8xf32>
    %94 = vector.extract_strided_slice %93 {offsets = [0, 0], sizes = [8, 8], strides = [1, 1]} : vector<32x8xf32> to vector<8x8xf32>
    %95 = arith.truncf %94 : vector<8x8xf32> to vector<8x8xbf16>
    %96 = vector.extract_strided_slice %61 {offsets = [0, 0], sizes = [8, 8], strides = [1, 1]} : vector<8x32xf32> to vector<8x8xf32>
    %97 = arith.truncf %96 : vector<8x8xf32> to vector<8x8xbf16>
    %cst_34 = arith.constant dense<0.000000e+00> : vector<8x8xf32>
    %98 = tpu.matmul %95, %97, %cst_34 {dimension_numbers = #tpu.dot_dimension_numbers<[1], [0], [0], [1], [0, 0, 1, 1], [], []>} : vector<8x8xbf16>, vector<8x8xbf16>, vector<8x8xf32> -> vector<8x8xf32>
    %99 = vector.extract_strided_slice %93 {offsets = [8, 0], sizes = [8, 8], strides = [1, 1]} : vector<32x8xf32> to vector<8x8xf32>
    %100 = arith.truncf %99 : vector<8x8xf32> to vector<8x8xbf16>
    %101 = vector.extract_strided_slice %61 {offsets = [0, 8], sizes = [8, 8], strides = [1, 1]} : vector<8x32xf32> to vector<8x8xf32>
    %102 = arith.truncf %101 : vector<8x8xf32> to vector<8x8xbf16>
    %cst_35 = arith.constant dense<0.000000e+00> : vector<8x8xf32>
    %103 = tpu.matmul %100, %102, %cst_35 {dimension_numbers = #tpu.dot_dimension_numbers<[1], [0], [0], [1], [0, 0, 1, 1], [], []>} : vector<8x8xbf16>, vector<8x8xbf16>, vector<8x8xf32> -> vector<8x8xf32>
    %104 = vector.extract_strided_slice %93 {offsets = [16, 0], sizes = [8, 8], strides = [1, 1]} : vector<32x8xf32> to vector<8x8xf32>
    %105 = arith.truncf %104 : vector<8x8xf32> to vector<8x8xbf16>
    %106 = vector.extract_strided_slice %61 {offsets = [0, 16], sizes = [8, 8], strides = [1, 1]} : vector<8x32xf32> to vector<8x8xf32>
    %107 = arith.truncf %106 : vector<8x8xf32> to vector<8x8xbf16>
    %cst_36 = arith.constant dense<0.000000e+00> : vector<8x8xf32>
    %108 = tpu.matmul %105, %107, %cst_36 {dimension_numbers = #tpu.dot_dimension_numbers<[1], [0], [0], [1], [0, 0, 1, 1], [], []>} : vector<8x8xbf16>, vector<8x8xbf16>, vector<8x8xf32> -> vector<8x8xf32>
    %109 = vector.extract_strided_slice %93 {offsets = [24, 0], sizes = [8, 8], strides = [1, 1]} : vector<32x8xf32> to vector<8x8xf32>
    %110 = arith.truncf %109 : vector<8x8xf32> to vector<8x8xbf16>
    %111 = vector.extract_strided_slice %61 {offsets = [0, 24], sizes = [8, 8], strides = [1, 1]} : vector<8x32xf32> to vector<8x8xf32>
    %112 = arith.truncf %111 : vector<8x8xf32> to vector<8x8xbf16>
    %cst_37 = arith.constant dense<0.000000e+00> : vector<8x8xf32>
    %113 = tpu.matmul %110, %112, %cst_37 {dimension_numbers = #tpu.dot_dimension_numbers<[1], [0], [0], [1], [0, 0, 1, 1], [], []>} : vector<8x8xbf16>, vector<8x8xbf16>, vector<8x8xf32> -> vector<8x8xf32>
    %114 = tpu.concatenate %98, %103, %108, %113 in 1 : vector<8x8xf32>, vector<8x8xf32>, vector<8x8xf32>, vector<8x8xf32> -> vector<8x32xf32>
    %115 = vector.extract_strided_slice %56 {offsets = [8, 0], sizes = [8, 32], strides = [1, 1]} : vector<16x32xf32> to vector<8x32xf32>
    %116 = vector.extract_strided_slice %57 {offsets = [8, 0], sizes = [8, 32], strides = [1, 1]} : vector<16x32xf32> to vector<8x32xf32>
    %117 = vector.extract_strided_slice %58 {offsets = [8, 0], sizes = [8, 32], strides = [1, 1]} : vector<16x32xf32> to vector<8x32xf32>
    %118 = vector.extract_strided_slice %115 {offsets = [0, 0], sizes = [8, 8], strides = [1, 1]} : vector<8x32xf32> to vector<8x8xf32>
    %119 = arith.truncf %118 : vector<8x8xf32> to vector<8x8xbf16>
    %120 = vector.extract_strided_slice %116 {offsets = [0, 0], sizes = [8, 8], strides = [1, 1]} : vector<8x32xf32> to vector<8x8xf32>
    %121 = arith.truncf %120 : vector<8x8xf32> to vector<8x8xbf16>
    %cst_38 = arith.constant dense<0.000000e+00> : vector<8x8xf32>
    %122 = tpu.matmul %119, %121, %cst_38 {dimension_numbers = #tpu.dot_dimension_numbers<[1], [1], [0], [0], [0, 0, 1, 0], [], []>} : vector<8x8xbf16>, vector<8x8xbf16>, vector<8x8xf32> -> vector<8x8xf32>
    %123 = vector.extract_strided_slice %115 {offsets = [0, 8], sizes = [8, 8], strides = [1, 1]} : vector<8x32xf32> to vector<8x8xf32>
    %124 = arith.truncf %123 : vector<8x8xf32> to vector<8x8xbf16>
    %125 = vector.extract_strided_slice %116 {offsets = [0, 8], sizes = [8, 8], strides = [1, 1]} : vector<8x32xf32> to vector<8x8xf32>
    %126 = arith.truncf %125 : vector<8x8xf32> to vector<8x8xbf16>
    %cst_39 = arith.constant dense<0.000000e+00> : vector<8x8xf32>
    %127 = tpu.matmul %124, %126, %cst_39 {dimension_numbers = #tpu.dot_dimension_numbers<[1], [1], [0], [0], [0, 0, 1, 0], [], []>} : vector<8x8xbf16>, vector<8x8xbf16>, vector<8x8xf32> -> vector<8x8xf32>
    %128 = vector.extract_strided_slice %115 {offsets = [0, 16], sizes = [8, 8], strides = [1, 1]} : vector<8x32xf32> to vector<8x8xf32>
    %129 = arith.truncf %128 : vector<8x8xf32> to vector<8x8xbf16>
    %130 = vector.extract_strided_slice %116 {offsets = [0, 16], sizes = [8, 8], strides = [1, 1]} : vector<8x32xf32> to vector<8x8xf32>
    %131 = arith.truncf %130 : vector<8x8xf32> to vector<8x8xbf16>
    %cst_40 = arith.constant dense<0.000000e+00> : vector<8x8xf32>
    %132 = tpu.matmul %129, %131, %cst_40 {dimension_numbers = #tpu.dot_dimension_numbers<[1], [1], [0], [0], [0, 0, 1, 0], [], []>} : vector<8x8xbf16>, vector<8x8xbf16>, vector<8x8xf32> -> vector<8x8xf32>
    %133 = vector.extract_strided_slice %115 {offsets = [0, 24], sizes = [8, 8], strides = [1, 1]} : vector<8x32xf32> to vector<8x8xf32>
    %134 = arith.truncf %133 : vector<8x8xf32> to vector<8x8xbf16>
    %135 = vector.extract_strided_slice %116 {offsets = [0, 24], sizes = [8, 8], strides = [1, 1]} : vector<8x32xf32> to vector<8x8xf32>
    %136 = arith.truncf %135 : vector<8x8xf32> to vector<8x8xbf16>
    %cst_41 = arith.constant dense<0.000000e+00> : vector<8x8xf32>
    %137 = tpu.matmul %134, %136, %cst_41 {dimension_numbers = #tpu.dot_dimension_numbers<[1], [1], [0], [0], [0, 0, 1, 0], [], []>} : vector<8x8xbf16>, vector<8x8xbf16>, vector<8x8xf32> -> vector<8x8xf32>
    %138 = tpu.concatenate %122, %127, %132, %137 in 0 : vector<8x8xf32>, vector<8x8xf32>, vector<8x8xf32>, vector<8x8xf32> -> vector<32x8xf32>
    %cst_42 = arith.constant 0.353553385 : f32
    %139 = vector.broadcast %cst_42 : f32 to vector<32x8xf32>
    %140 = arith.mulf %138, %139 : vector<32x8xf32>
    %cst_43 = arith.constant dense<0xFF800000> : vector<32xf32>
    %141 = vector.multi_reduction <maximumf>, %140, %cst_43 [1] : vector<32x8xf32> to vector<32xf32>
    %142 = vector.shape_cast %141 : vector<32xf32> to vector<32x1xf32>
    %143 = vector.broadcast %142 : vector<32x1xf32> to vector<32x8xf32>
    %144 = arith.subf %140, %143 : vector<32x8xf32>
    %145 = math.exp %144 : vector<32x8xf32>
    %cst_44 = arith.constant dense<0.000000e+00> : vector<32xf32>
    %146 = vector.multi_reduction <add>, %145, %cst_44 [1] : vector<32x8xf32> to vector<32xf32>
    %147 = vector.shape_cast %146 : vector<32xf32> to vector<32x1xf32>
    %148 = vector.broadcast %147 : vector<32x1xf32> to vector<32x8xf32>
    %149 = arith.divf %145, %148 : vector<32x8xf32>
    %150 = vector.extract_strided_slice %149 {offsets = [0, 0], sizes = [8, 8], strides = [1, 1]} : vector<32x8xf32> to vector<8x8xf32>
    %151 = arith.truncf %150 : vector<8x8xf32> to vector<8x8xbf16>
    %152 = vector.extract_strided_slice %117 {offsets = [0, 0], sizes = [8, 8], strides = [1, 1]} : vector<8x32xf32> to vector<8x8xf32>
    %153 = arith.truncf %152 : vector<8x8xf32> to vector<8x8xbf16>
    %cst_45 = arith.constant dense<0.000000e+00> : vector<8x8xf32>
    %154 = tpu.matmul %151, %153, %cst_45 {dimension_numbers = #tpu.dot_dimension_numbers<[1], [0], [0], [1], [0, 0, 1, 1], [], []>} : vector<8x8xbf16>, vector<8x8xbf16>, vector<8x8xf32> -> vector<8x8xf32>
    %155 = vector.extract_strided_slice %149 {offsets = [8, 0], sizes = [8, 8], strides = [1, 1]} : vector<32x8xf32> to vector<8x8xf32>
    %156 = arith.truncf %155 : vector<8x8xf32> to vector<8x8xbf16>
    %157 = vector.extract_strided_slice %117 {offsets = [0, 8], sizes = [8, 8], strides = [1, 1]} : vector<8x32xf32> to vector<8x8xf32>
    %158 = arith.truncf %157 : vector<8x8xf32> to vector<8x8xbf16>
    %cst_46 = arith.constant dense<0.000000e+00> : vector<8x8xf32>
    %159 = tpu.matmul %156, %158, %cst_46 {dimension_numbers = #tpu.dot_dimension_numbers<[1], [0], [0], [1], [0, 0, 1, 1], [], []>} : vector<8x8xbf16>, vector<8x8xbf16>, vector<8x8xf32> -> vector<8x8xf32>
    %160 = vector.extract_strided_slice %149 {offsets = [16, 0], sizes = [8, 8], strides = [1, 1]} : vector<32x8xf32> to vector<8x8xf32>
    %161 = arith.truncf %160 : vector<8x8xf32> to vector<8x8xbf16>
    %162 = vector.extract_strided_slice %117 {offsets = [0, 16], sizes = [8, 8], strides = [1, 1]} : vector<8x32xf32> to vector<8x8xf32>
    %163 = arith.truncf %162 : vector<8x8xf32> to vector<8x8xbf16>
    %cst_47 = arith.constant dense<0.000000e+00> : vector<8x8xf32>
    %164 = tpu.matmul %161, %163, %cst_47 {dimension_numbers = #tpu.dot_dimension_numbers<[1], [0], [0], [1], [0, 0, 1, 1], [], []>} : vector<8x8xbf16>, vector<8x8xbf16>, vector<8x8xf32> -> vector<8x8xf32>
    %165 = vector.extract_strided_slice %149 {offsets = [24, 0], sizes = [8, 8], strides = [1, 1]} : vector<32x8xf32> to vector<8x8xf32>
    %166 = arith.truncf %165 : vector<8x8xf32> to vector<8x8xbf16>
    %167 = vector.extract_strided_slice %117 {offsets = [0, 24], sizes = [8, 8], strides = [1, 1]} : vector<8x32xf32> to vector<8x8xf32>
    %168 = arith.truncf %167 : vector<8x8xf32> to vector<8x8xbf16>
    %cst_48 = arith.constant dense<0.000000e+00> : vector<8x8xf32>
    %169 = tpu.matmul %166, %168, %cst_48 {dimension_numbers = #tpu.dot_dimension_numbers<[1], [0], [0], [1], [0, 0, 1, 1], [], []>} : vector<8x8xbf16>, vector<8x8xbf16>, vector<8x8xf32> -> vector<8x8xf32>
    %170 = tpu.concatenate %154, %159, %164, %169 in 1 : vector<8x8xf32>, vector<8x8xf32>, vector<8x8xf32>, vector<8x8xf32> -> vector<8x32xf32>
    %171 = tpu.concatenate %114, %170 in 0 : vector<8x32xf32>, vector<8x32xf32> -> vector<16x32xf32>
    %c0_49 = arith.constant 0 : index
    %c0_50 = arith.constant 0 : index
    %c0_51 = arith.constant 0 : index
    %172 = vector.load %arg7[%c0_49, %c0_50, %c0_51] : memref<2x32x32xf32, #tpu.memory_space<vmem>>, vector<1x32x32xf32>
    %173 = vector.shape_cast %172 : vector<1x32x32xf32> to vector<32x32xf32>
    %c0_52 = arith.constant 0 : index
    %c0_53 = arith.constant 0 : index
    %c0_54 = arith.constant 0 : index
    %174 = vector.load %arg8[%c0_52, %c0_53, %c0_54] : memref<2x1x32xf32, #tpu.memory_space<vmem>>, vector<1x1x32xf32>
    %175 = vector.shape_cast %174 : vector<1x1x32xf32> to vector<1x32xf32>
    %176 = arith.truncf %171 : vector<16x32xf32> to vector<16x32xbf16>
    %177 = arith.truncf %173 : vector<32x32xf32> to vector<32x32xbf16>
    %cst_55 = arith.constant dense<0.000000e+00> : vector<16x32xf32>
    %178 = tpu.matmul %176, %177, %cst_55 {dimension_numbers = #tpu.dot_dimension_numbers<[1], [0], [0], [1], [0, 0, 1, 1], [], []>} : vector<16x32xbf16>, vector<32x32xbf16>, vector<16x32xf32> -> vector<16x32xf32>
    %179 = vector.broadcast %175 : vector<1x32xf32> to vector<16x32xf32>
    %180 = arith.addf %178, %179 : vector<16x32xf32>
    %181 = arith.addf %22, %180 : vector<16x32xf32>
    %c0_56 = arith.constant 0 : index
    %c0_57 = arith.constant 0 : index
    %c0_58 = arith.constant 0 : index
    %182 = vector.load %arg9[%c0_56, %c0_57, %c0_58] : memref<2x1x32xf32, #tpu.memory_space<vmem>>, vector<1x1x32xf32>
    %183 = vector.shape_cast %182 : vector<1x1x32xf32> to vector<1x32xf32>
    %c0_59 = arith.constant 0 : index
    %c0_60 = arith.constant 0 : index
    %c0_61 = arith.constant 0 : index
    %184 = vector.load %arg10[%c0_59, %c0_60, %c0_61] : memref<2x1x32xf32, #tpu.memory_space<vmem>>, vector<1x1x32xf32>
    %185 = vector.shape_cast %184 : vector<1x1x32xf32> to vector<1x32xf32>
    %cst_62 = arith.constant dense<0.000000e+00> : vector<16xf32>
    %186 = vector.multi_reduction <add>, %181, %cst_62 [1] : vector<16x32xf32> to vector<16xf32>
    %187 = vector.shape_cast %186 : vector<16xf32> to vector<16x1xf32>
    %cst_63 = arith.constant 3.200000e+01 : f32
    %188 = vector.broadcast %cst_63 : f32 to vector<16x1xf32>
    %189 = arith.divf %187, %188 : vector<16x1xf32>
    %190 = vector.broadcast %189 : vector<16x1xf32> to vector<16x32xf32>
    %191 = arith.subf %181, %190 : vector<16x32xf32>
    %192 = arith.mulf %191, %191 : vector<16x32xf32>
    %cst_64 = arith.constant dense<0.000000e+00> : vector<16xf32>
    %193 = vector.multi_reduction <add>, %192, %cst_64 [1] : vector<16x32xf32> to vector<16xf32>
    %194 = vector.shape_cast %193 : vector<16xf32> to vector<16x1xf32>
    %cst_65 = arith.constant 0.0322580636 : f32
    %195 = vector.broadcast %cst_65 : f32 to vector<16x1xf32>
    %196 = arith.mulf %194, %195 : vector<16x1xf32>
    %197 = math.sqrt %196 : vector<16x1xf32>
    %198 = vector.broadcast %183 : vector<1x32xf32> to vector<16x32xf32>
    %199 = arith.mulf %198, %191 : vector<16x32xf32>
    %cst_66 = arith.constant 9.99999997E-7 : f32
    %200 = vector.broadcast %cst_66 : f32 to vector<16x1xf32>
    %201 = arith.addf %197, %200 : vector<16x1xf32>
    %202 = vector.broadcast %201 : vector<16x1xf32> to vector<16x32xf32>
    %203 = arith.divf %199, %202 : vector<16x32xf32>
    %204 = vector.broadcast %185 : vector<1x32xf32> to vector<16x32xf32>
    %205 = arith.addf %203, %204 : vector<16x32xf32>
    %c0_67 = arith.constant 0 : index
    %c0_68 = arith.constant 0 : index
    %c0_69 = arith.constant 0 : index
    %206 = vector.load %arg11[%c0_67, %c0_68, %c0_69] : memref<2x32x64xf32, #tpu.memory_space<vmem>>, vector<1x32x64xf32>
    %207 = vector.shape_cast %206 : vector<1x32x64xf32> to vector<32x64xf32>
    %c0_70 = arith.constant 0 : index
    %c0_71 = arith.constant 0 : index
    %c0_72 = arith.constant 0 : index
    %208 = vector.load %arg12[%c0_70, %c0_71, %c0_72] : memref<2x1x64xf32, #tpu.memory_space<vmem>>, vector<1x1x64xf32>
    %209 = vector.shape_cast %208 : vector<1x1x64xf32> to vector<1x64xf32>
    %210 = arith.truncf %205 : vector<16x32xf32> to vector<16x32xbf16>
    %211 = arith.truncf %207 : vector<32x64xf32> to vector<32x64xbf16>
    %cst_73 = arith.constant dense<0.000000e+00> : vector<16x64xf32>
    %212 = tpu.matmul %210, %211, %cst_73 {dimension_numbers = #tpu.dot_dimension_numbers<[1], [0], [0], [1], [0, 0, 1, 1], [], []>} : vector<16x32xbf16>, vector<32x64xbf16>, vector<16x64xf32> -> vector<16x64xf32>
    %213 = vector.broadcast %209 : vector<1x64xf32> to vector<16x64xf32>
    %214 = arith.addf %212, %213 : vector<16x64xf32>
    %cst_74 = arith.constant 0.000000e+00 : f32
    %215 = vector.broadcast %cst_74 : f32 to vector<16x64xf32>
    %216 = arith.maximumf %214, %215 : vector<16x64xf32>
    %c0_75 = arith.constant 0 : index
    %c0_76 = arith.constant 0 : index
    %c0_77 = arith.constant 0 : index
    %217 = vector.load %arg13[%c0_75, %c0_76, %c0_77] : memref<2x64x32xf32, #tpu.memory_space<vmem>>, vector<1x64x32xf32>
    %218 = vector.shape_cast %217 : vector<1x64x32xf32> to vector<64x32xf32>
    %c0_78 = arith.constant 0 : index
    %c0_79 = arith.constant 0 : index
    %c0_80 = arith.constant 0 : index
    %219 = vector.load %arg14[%c0_78, %c0_79, %c0_80] : memref<2x1x32xf32, #tpu.memory_space<vmem>>, vector<1x1x32xf32>
    %220 = vector.shape_cast %219 : vector<1x1x32xf32> to vector<1x32xf32>
    %221 = arith.truncf %216 : vector<16x64xf32> to vector<16x64xbf16>
    %222 = arith.truncf %218 : vector<64x32xf32> to vector<64x32xbf16>
    %cst_81 = arith.constant dense<0.000000e+00> : vector<16x32xf32>
    %223 = tpu.matmul %221, %222, %cst_81 {dimension_numbers = #tpu.dot_dimension_numbers<[1], [0], [0], [1], [0, 0, 1, 1], [], []>} : vector<16x64xbf16>, vector<64x32xbf16>, vector<16x32xf32> -> vector<16x32xf32>
    %224 = vector.broadcast %220 : vector<1x32xf32> to vector<16x32xf32>
    %225 = arith.addf %223, %224 : vector<16x32xf32>
    %226 = arith.addf %181, %225 : vector<16x32xf32>
    %c1 = arith.constant 1 : index
    %c0_82 = arith.constant 0 : index
    %c0_83 = arith.constant 0 : index
    %227 = vector.load %arg3[%c1, %c0_82, %c0_83] : memref<2x1x32xf32, #tpu.memory_space<vmem>>, vector<1x1x32xf32>
    %228 = vector.shape_cast %227 : vector<1x1x32xf32> to vector<1x32xf32>
    %c1_84 = arith.constant 1 : index
    %c0_85 = arith.constant 0 : index
    %c0_86 = arith.constant 0 : index
    %229 = vector.load %arg4[%c1_84, %c0_85, %c0_86] : memref<2x1x32xf32, #tpu.memory_space<vmem>>, vector<1x1x32xf32>
    %230 = vector.shape_cast %229 : vector<1x1x32xf32> to vector<1x32xf32>
    %cst_87 = arith.constant dense<0.000000e+00> : vector<16xf32>
    %231 = vector.multi_reduction <add>, %226, %cst_87 [1] : vector<16x32xf32> to vector<16xf32>
    %232 = vector.shape_cast %231 : vector<16xf32> to vector<16x1xf32>
    %cst_88 = arith.constant 3.200000e+01 : f32
    %233 = vector.broadcast %cst_88 : f32 to vector<16x1xf32>
    %234 = arith.divf %232, %233 : vector<16x1xf32>
    %235 = vector.broadcast %234 : vector<16x1xf32> to vector<16x32xf32>
    %236 = arith.subf %226, %235 : vector<16x32xf32>
    %237 = arith.mulf %236, %236 : vector<16x32xf32>
    %cst_89 = arith.constant dense<0.000000e+00> : vector<16xf32>
    %238 = vector.multi_reduction <add>, %237, %cst_89 [1] : vector<16x32xf32> to vector<16xf32>
    %239 = vector.shape_cast %238 : vector<16xf32> to vector<16x1xf32>
    %cst_90 = arith.constant 0.0322580636 : f32
    %240 = vector.broadcast %cst_90 : f32 to vector<16x1xf32>
    %241 = arith.mulf %239, %240 : vector<16x1xf32>
    %242 = math.sqrt %241 : vector<16x1xf32>
    %243 = vector.broadcast %228 : vector<1x32xf32> to vector<16x32xf32>
    %244 = arith.mulf %243, %236 : vector<16x32xf32>
    %cst_91 = arith.constant 9.99999997E-7 : f32
    %245 = vector.broadcast %cst_91 : f32 to vector<16x1xf32>
    %246 = arith.addf %242, %245 : vector<16x1xf32>
    %247 = vector.broadcast %246 : vector<16x1xf32> to vector<16x32xf32>
    %248 = arith.divf %244, %247 : vector<16x32xf32>
    %249 = vector.broadcast %230 : vector<1x32xf32> to vector<16x32xf32>
    %250 = arith.addf %248, %249 : vector<16x32xf32>
    %c1_92 = arith.constant 1 : index
    %c0_93 = arith.constant 0 : index
    %c0_94 = arith.constant 0 : index
    %251 = vector.load %arg5[%c1_92, %c0_93, %c0_94] : memref<2x32x96xf32, #tpu.memory_space<vmem>>, vector<1x32x96xf32>
    %252 = vector.shape_cast %251 : vector<1x32x96xf32> to vector<32x96xf32>
    %c1_95 = arith.constant 1 : index
    %c0_96 = arith.constant 0 : index
    %c0_97 = arith.constant 0 : index
    %253 = vector.load %arg6[%c1_95, %c0_96, %c0_97] : memref<2x1x96xf32, #tpu.memory_space<vmem>>, vector<1x1x96xf32>
    %254 = vector.shape_cast %253 : vector<1x1x96xf32> to vector<1x96xf32>
    %255 = arith.truncf %250 : vector<16x32xf32> to vector<16x32xbf16>
    %256 = arith.truncf %252 : vector<32x96xf32> to vector<32x96xbf16>
    %cst_98 = arith.constant dense<0.000000e+00> : vector<16x96xf32>
    %257 = tpu.matmul %255, %256, %cst_98 {dimension_numbers = #tpu.dot_dimension_numbers<[1], [0], [0], [1], [0, 0, 1, 1], [], []>} : vector<16x32xbf16>, vector<32x96xbf16>, vector<16x96xf32> -> vector<16x96xf32>
    %258 = vector.broadcast %254 : vector<1x96xf32> to vector<16x96xf32>
    %259 = arith.addf %257, %258 : vector<16x96xf32>
    %260 = vector.extract_strided_slice %259 {offsets = [0, 0], sizes = [16, 32], strides = [1, 1]} : vector<16x96xf32> to vector<16x32xf32>
    %261 = vector.extract_strided_slice %259 {offsets = [0, 32], sizes = [16, 32], strides = [1, 1]} : vector<16x96xf32> to vector<16x32xf32>
    %262 = vector.extract_strided_slice %259 {offsets = [0, 64], sizes = [16, 32], strides = [1, 1]} : vector<16x96xf32> to vector<16x32xf32>
    %263 = vector.extract_strided_slice %260 {offsets = [0, 0], sizes = [8, 32], strides = [1, 1]} : vector<16x32xf32> to vector<8x32xf32>
    %264 = vector.extract_strided_slice %261 {offsets = [0, 0], sizes = [8, 32], strides = [1, 1]} : vector<16x32xf32> to vector<8x32xf32>
    %265 = vector.extract_strided_slice %262 {offsets = [0, 0], sizes = [8, 32], strides = [1, 1]} : vector<16x32xf32> to vector<8x32xf32>
    %266 = vector.extract_strided_slice %263 {offsets = [0, 0], sizes = [8, 8], strides = [1, 1]} : vector<8x32xf32> to vector<8x8xf32>
    %267 = arith.truncf %266 : vector<8x8xf32> to vector<8x8xbf16>
    %268 = vector.extract_strided_slice %264 {offsets = [0, 0], sizes = [8, 8], strides = [1, 1]} : vector<8x32xf32> to vector<8x8xf32>
    %269 = arith.truncf %268 : vector<8x8xf32> to vector<8x8xbf16>
    %cst_99 = arith.constant dense<0.000000e+00> : vector<8x8xf32>
    %270 = tpu.matmul %267, %269, %cst_99 {dimension_numbers = #tpu.dot_dimension_numbers<[1], [1], [0], [0], [0, 0, 1, 0], [], []>} : vector<8x8xbf16>, vector<8x8xbf16>, vector<8x8xf32> -> vector<8x8xf32>
    %271 = vector.extract_strided_slice %263 {offsets = [0, 8], sizes = [8, 8], strides = [1, 1]} : vector<8x32xf32> to vector<8x8xf32>
    %272 = arith.truncf %271 : vector<8x8xf32> to vector<8x8xbf16>
    %273 = vector.extract_strided_slice %264 {offsets = [0, 8], sizes = [8, 8], strides = [1, 1]} : vector<8x32xf32> to vector<8x8xf32>
    %274 = arith.truncf %273 : vector<8x8xf32> to vector<8x8xbf16>
    %cst_100 = arith.constant dense<0.000000e+00> : vector<8x8xf32>
    %275 = tpu.matmul %272, %274, %cst_100 {dimension_numbers = #tpu.dot_dimension_numbers<[1], [1], [0], [0], [0, 0, 1, 0], [], []>} : vector<8x8xbf16>, vector<8x8xbf16>, vector<8x8xf32> -> vector<8x8xf32>
    %276 = vector.extract_strided_slice %263 {offsets = [0, 16], sizes = [8, 8], strides = [1, 1]} : vector<8x32xf32> to vector<8x8xf32>
    %277 = arith.truncf %276 : vector<8x8xf32> to vector<8x8xbf16>
    %278 = vector.extract_strided_slice %264 {offsets = [0, 16], sizes = [8, 8], strides = [1, 1]} : vector<8x32xf32> to vector<8x8xf32>
    %279 = arith.truncf %278 : vector<8x8xf32> to vector<8x8xbf16>
    %cst_101 = arith.constant dense<0.000000e+00> : vector<8x8xf32>
    %280 = tpu.matmul %277, %279, %cst_101 {dimension_numbers = #tpu.dot_dimension_numbers<[1], [1], [0], [0], [0, 0, 1, 0], [], []>} : vector<8x8xbf16>, vector<8x8xbf16>, vector<8x8xf32> -> vector<8x8xf32>
    %281 = vector.extract_strided_slice %263 {offsets = [0, 24], sizes = [8, 8], strides = [1, 1]} : vector<8x32xf32> to vector<8x8xf32>
    %282 = arith.truncf %281 : vector<8x8xf32> to vector<8x8xbf16>
    %283 = vector.extract_strided_slice %264 {offsets = [0, 24], sizes = [8, 8], strides = [1, 1]} : vector<8x32xf32> to vector<8x8xf32>
    %284 = arith.truncf %283 : vector<8x8xf32> to vector<8x8xbf16>
    %cst_102 = arith.constant dense<0.000000e+00> : vector<8x8xf32>
    %285 = tpu.matmul %282, %284, %cst_102 {dimension_numbers = #tpu.dot_dimension_numbers<[1], [1], [0], [0], [0, 0, 1, 0], [], []>} : vector<8x8xbf16>, vector<8x8xbf16>, vector<8x8xf32> -> vector<8x8xf32>
    %286 = tpu.concatenate %270, %275, %280, %285 in 0 : vector<8x8xf32>, vector<8x8xf32>, vector<8x8xf32>, vector<8x8xf32> -> vector<32x8xf32>
    %cst_103 = arith.constant 0.353553385 : f32
    %287 = vector.broadcast %cst_103 : f32 to vector<32x8xf32>
    %288 = arith.mulf %286, %287 : vector<32x8xf32>
    %cst_104 = arith.constant dense<0xFF800000> : vector<32xf32>
    %289 = vector.multi_reduction <maximumf>, %288, %cst_104 [1] : vector<32x8xf32> to vector<32xf32>
    %290 = vector.shape_cast %289 : vector<32xf32> to vector<32x1xf32>
    %291 = vector.broadcast %290 : vector<32x1xf32> to vector<32x8xf32>
    %292 = arith.subf %288, %291 : vector<32x8xf32>
    %293 = math.exp %292 : vector<32x8xf32>
    %cst_105 = arith.constant dense<0.000000e+00> : vector<32xf32>
    %294 = vector.multi_reduction <add>, %293, %cst_105 [1] : vector<32x8xf32> to vector<32xf32>
    %295 = vector.shape_cast %294 : vector<32xf32> to vector<32x1xf32>
    %296 = vector.broadcast %295 : vector<32x1xf32> to vector<32x8xf32>
    %297 = arith.divf %293, %296 : vector<32x8xf32>
    %298 = vector.extract_strided_slice %297 {offsets = [0, 0], sizes = [8, 8], strides = [1, 1]} : vector<32x8xf32> to vector<8x8xf32>
    %299 = arith.truncf %298 : vector<8x8xf32> to vector<8x8xbf16>
    %300 = vector.extract_strided_slice %265 {offsets = [0, 0], sizes = [8, 8], strides = [1, 1]} : vector<8x32xf32> to vector<8x8xf32>
    %301 = arith.truncf %300 : vector<8x8xf32> to vector<8x8xbf16>
    %cst_106 = arith.constant dense<0.000000e+00> : vector<8x8xf32>
    %302 = tpu.matmul %299, %301, %cst_106 {dimension_numbers = #tpu.dot_dimension_numbers<[1], [0], [0], [1], [0, 0, 1, 1], [], []>} : vector<8x8xbf16>, vector<8x8xbf16>, vector<8x8xf32> -> vector<8x8xf32>
    %303 = vector.extract_strided_slice %297 {offsets = [8, 0], sizes = [8, 8], strides = [1, 1]} : vector<32x8xf32> to vector<8x8xf32>
    %304 = arith.truncf %303 : vector<8x8xf32> to vector<8x8xbf16>
    %305 = vector.extract_strided_slice %265 {offsets = [0, 8], sizes = [8, 8], strides = [1, 1]} : vector<8x32xf32> to vector<8x8xf32>
    %306 = arith.truncf %305 : vector<8x8xf32> to vector<8x8xbf16>
    %cst_107 = arith.constant dense<0.000000e+00> : vector<8x8xf32>
    %307 = tpu.matmul %304, %306, %cst_107 {dimension_numbers = #tpu.dot_dimension_numbers<[1], [0], [0], [1], [0, 0, 1, 1], [], []>} : vector<8x8xbf16>, vector<8x8xbf16>, vector<8x8xf32> -> vector<8x8xf32>
    %308 = vector.extract_strided_slice %297 {offsets = [16, 0], sizes = [8, 8], strides = [1, 1]} : vector<32x8xf32> to vector<8x8xf32>
    %309 = arith.truncf %308 : vector<8x8xf32> to vector<8x8xbf16>
    %310 = vector.extract_strided_slice %265 {offsets = [0, 16], sizes = [8, 8], strides = [1, 1]} : vector<8x32xf32> to vector<8x8xf32>
    %311 = arith.truncf %310 : vector<8x8xf32> to vector<8x8xbf16>
    %cst_108 = arith.constant dense<0.000000e+00> : vector<8x8xf32>
    %312 = tpu.matmul %309, %311, %cst_108 {dimension_numbers = #tpu.dot_dimension_numbers<[1], [0], [0], [1], [0, 0, 1, 1], [], []>} : vector<8x8xbf16>, vector<8x8xbf16>, vector<8x8xf32> -> vector<8x8xf32>
    %313 = vector.extract_strided_slice %297 {offsets = [24, 0], sizes = [8, 8], strides = [1, 1]} : vector<32x8xf32> to vector<8x8xf32>
    %314 = arith.truncf %313 : vector<8x8xf32> to vector<8x8xbf16>
    %315 = vector.extract_strided_slice %265 {offsets = [0, 24], sizes = [8, 8], strides = [1, 1]} : vector<8x32xf32> to vector<8x8xf32>
    %316 = arith.truncf %315 : vector<8x8xf32> to vector<8x8xbf16>
    %cst_109 = arith.constant dense<0.000000e+00> : vector<8x8xf32>
    %317 = tpu.matmul %314, %316, %cst_109 {dimension_numbers = #tpu.dot_dimension_numbers<[1], [0], [0], [1], [0, 0, 1, 1], [], []>} : vector<8x8xbf16>, vector<8x8xbf16>, vector<8x8xf32> -> vector<8x8xf32>
    %318 = tpu.concatenate %302, %307, %312, %317 in 1 : vector<8x8xf32>, vector<8x8xf32>, vector<8x8xf32>, vector<8x8xf32> -> vector<8x32xf32>
    %319 = vector.extract_strided_slice %260 {offsets = [8, 0], sizes = [8, 32], strides = [1, 1]} : vector<16x32xf32> to vector<8x32xf32>
    %320 = vector.extract_strided_slice %261 {offsets = [8, 0], sizes = [8, 32], strides = [1, 1]} : vector<16x32xf32> to vector<8x32xf32>
    %321 = vector.extract_strided_slice %262 {offsets = [8, 0], sizes = [8, 32], strides = [1, 1]} : vector<16x32xf32> to vector<8x32xf32>
    %322 = vector.extract_strided_slice %319 {offsets = [0, 0], sizes = [8, 8], strides = [1, 1]} : vector<8x32xf32> to vector<8x8xf32>
    %323 = arith.truncf %322 : vector<8x8xf32> to vector<8x8xbf16>
    %324 = vector.extract_strided_slice %320 {offsets = [0, 0], sizes = [8, 8], strides = [1, 1]} : vector<8x32xf32> to vector<8x8xf32>
    %325 = arith.truncf %324 : vector<8x8xf32> to vector<8x8xbf16>
    %cst_110 = arith.constant dense<0.000000e+00> : vector<8x8xf32>
    %326 = tpu.matmul %323, %325, %cst_110 {dimension_numbers = #tpu.dot_dimension_numbers<[1], [1], [0], [0], [0, 0, 1, 0], [], []>} : vector<8x8xbf16>, vector<8x8xbf16>, vector<8x8xf32> -> vector<8x8xf32>
    %327 = vector.extract_strided_slice %319 {offsets = [0, 8], sizes = [8, 8], strides = [1, 1]} : vector<8x32xf32> to vector<8x8xf32>
    %328 = arith.truncf %327 : vector<8x8xf32> to vector<8x8xbf16>
    %329 = vector.extract_strided_slice %320 {offsets = [0, 8], sizes = [8, 8], strides = [1, 1]} : vector<8x32xf32> to vector<8x8xf32>
    %330 = arith.truncf %329 : vector<8x8xf32> to vector<8x8xbf16>
    %cst_111 = arith.constant dense<0.000000e+00> : vector<8x8xf32>
    %331 = tpu.matmul %328, %330, %cst_111 {dimension_numbers = #tpu.dot_dimension_numbers<[1], [1], [0], [0], [0, 0, 1, 0], [], []>} : vector<8x8xbf16>, vector<8x8xbf16>, vector<8x8xf32> -> vector<8x8xf32>
    %332 = vector.extract_strided_slice %319 {offsets = [0, 16], sizes = [8, 8], strides = [1, 1]} : vector<8x32xf32> to vector<8x8xf32>
    %333 = arith.truncf %332 : vector<8x8xf32> to vector<8x8xbf16>
    %334 = vector.extract_strided_slice %320 {offsets = [0, 16], sizes = [8, 8], strides = [1, 1]} : vector<8x32xf32> to vector<8x8xf32>
    %335 = arith.truncf %334 : vector<8x8xf32> to vector<8x8xbf16>
    %cst_112 = arith.constant dense<0.000000e+00> : vector<8x8xf32>
    %336 = tpu.matmul %333, %335, %cst_112 {dimension_numbers = #tpu.dot_dimension_numbers<[1], [1], [0], [0], [0, 0, 1, 0], [], []>} : vector<8x8xbf16>, vector<8x8xbf16>, vector<8x8xf32> -> vector<8x8xf32>
    %337 = vector.extract_strided_slice %319 {offsets = [0, 24], sizes = [8, 8], strides = [1, 1]} : vector<8x32xf32> to vector<8x8xf32>
    %338 = arith.truncf %337 : vector<8x8xf32> to vector<8x8xbf16>
    %339 = vector.extract_strided_slice %320 {offsets = [0, 24], sizes = [8, 8], strides = [1, 1]} : vector<8x32xf32> to vector<8x8xf32>
    %340 = arith.truncf %339 : vector<8x8xf32> to vector<8x8xbf16>
    %cst_113 = arith.constant dense<0.000000e+00> : vector<8x8xf32>
    %341 = tpu.matmul %338, %340, %cst_113 {dimension_numbers = #tpu.dot_dimension_numbers<[1], [1], [0], [0], [0, 0, 1, 0], [], []>} : vector<8x8xbf16>, vector<8x8xbf16>, vector<8x8xf32> -> vector<8x8xf32>
    %342 = tpu.concatenate %326, %331, %336, %341 in 0 : vector<8x8xf32>, vector<8x8xf32>, vector<8x8xf32>, vector<8x8xf32> -> vector<32x8xf32>
    %cst_114 = arith.constant 0.353553385 : f32
    %343 = vector.broadcast %cst_114 : f32 to vector<32x8xf32>
    %344 = arith.mulf %342, %343 : vector<32x8xf32>
    %cst_115 = arith.constant dense<0xFF800000> : vector<32xf32>
    %345 = vector.multi_reduction <maximumf>, %344, %cst_115 [1] : vector<32x8xf32> to vector<32xf32>
    %346 = vector.shape_cast %345 : vector<32xf32> to vector<32x1xf32>
    %347 = vector.broadcast %346 : vector<32x1xf32> to vector<32x8xf32>
    %348 = arith.subf %344, %347 : vector<32x8xf32>
    %349 = math.exp %348 : vector<32x8xf32>
    %cst_116 = arith.constant dense<0.000000e+00> : vector<32xf32>
    %350 = vector.multi_reduction <add>, %349, %cst_116 [1] : vector<32x8xf32> to vector<32xf32>
    %351 = vector.shape_cast %350 : vector<32xf32> to vector<32x1xf32>
    %352 = vector.broadcast %351 : vector<32x1xf32> to vector<32x8xf32>
    %353 = arith.divf %349, %352 : vector<32x8xf32>
    %354 = vector.extract_strided_slice %353 {offsets = [0, 0], sizes = [8, 8], strides = [1, 1]} : vector<32x8xf32> to vector<8x8xf32>
    %355 = arith.truncf %354 : vector<8x8xf32> to vector<8x8xbf16>
    %356 = vector.extract_strided_slice %321 {offsets = [0, 0], sizes = [8, 8], strides = [1, 1]} : vector<8x32xf32> to vector<8x8xf32>
    %357 = arith.truncf %356 : vector<8x8xf32> to vector<8x8xbf16>
    %cst_117 = arith.constant dense<0.000000e+00> : vector<8x8xf32>
    %358 = tpu.matmul %355, %357, %cst_117 {dimension_numbers = #tpu.dot_dimension_numbers<[1], [0], [0], [1], [0, 0, 1, 1], [], []>} : vector<8x8xbf16>, vector<8x8xbf16>, vector<8x8xf32> -> vector<8x8xf32>
    %359 = vector.extract_strided_slice %353 {offsets = [8, 0], sizes = [8, 8], strides = [1, 1]} : vector<32x8xf32> to vector<8x8xf32>
    %360 = arith.truncf %359 : vector<8x8xf32> to vector<8x8xbf16>
    %361 = vector.extract_strided_slice %321 {offsets = [0, 8], sizes = [8, 8], strides = [1, 1]} : vector<8x32xf32> to vector<8x8xf32>
    %362 = arith.truncf %361 : vector<8x8xf32> to vector<8x8xbf16>
    %cst_118 = arith.constant dense<0.000000e+00> : vector<8x8xf32>
    %363 = tpu.matmul %360, %362, %cst_118 {dimension_numbers = #tpu.dot_dimension_numbers<[1], [0], [0], [1], [0, 0, 1, 1], [], []>} : vector<8x8xbf16>, vector<8x8xbf16>, vector<8x8xf32> -> vector<8x8xf32>
    %364 = vector.extract_strided_slice %353 {offsets = [16, 0], sizes = [8, 8], strides = [1, 1]} : vector<32x8xf32> to vector<8x8xf32>
    %365 = arith.truncf %364 : vector<8x8xf32> to vector<8x8xbf16>
    %366 = vector.extract_strided_slice %321 {offsets = [0, 16], sizes = [8, 8], strides = [1, 1]} : vector<8x32xf32> to vector<8x8xf32>
    %367 = arith.truncf %366 : vector<8x8xf32> to vector<8x8xbf16>
    %cst_119 = arith.constant dense<0.000000e+00> : vector<8x8xf32>
    %368 = tpu.matmul %365, %367, %cst_119 {dimension_numbers = #tpu.dot_dimension_numbers<[1], [0], [0], [1], [0, 0, 1, 1], [], []>} : vector<8x8xbf16>, vector<8x8xbf16>, vector<8x8xf32> -> vector<8x8xf32>
    %369 = vector.extract_strided_slice %353 {offsets = [24, 0], sizes = [8, 8], strides = [1, 1]} : vector<32x8xf32> to vector<8x8xf32>
    %370 = arith.truncf %369 : vector<8x8xf32> to vector<8x8xbf16>
    %371 = vector.extract_strided_slice %321 {offsets = [0, 24], sizes = [8, 8], strides = [1, 1]} : vector<8x32xf32> to vector<8x8xf32>
    %372 = arith.truncf %371 : vector<8x8xf32> to vector<8x8xbf16>
    %cst_120 = arith.constant dense<0.000000e+00> : vector<8x8xf32>
    %373 = tpu.matmul %370, %372, %cst_120 {dimension_numbers = #tpu.dot_dimension_numbers<[1], [0], [0], [1], [0, 0, 1, 1], [], []>} : vector<8x8xbf16>, vector<8x8xbf16>, vector<8x8xf32> -> vector<8x8xf32>
    %374 = tpu.concatenate %358, %363, %368, %373 in 1 : vector<8x8xf32>, vector<8x8xf32>, vector<8x8xf32>, vector<8x8xf32> -> vector<8x32xf32>
    %375 = tpu.concatenate %318, %374 in 0 : vector<8x32xf32>, vector<8x32xf32> -> vector<16x32xf32>
    %c1_121 = arith.constant 1 : index
    %c0_122 = arith.constant 0 : index
    %c0_123 = arith.constant 0 : index
    %376 = vector.load %arg7[%c1_121, %c0_122, %c0_123] : memref<2x32x32xf32, #tpu.memory_space<vmem>>, vector<1x32x32xf32>
    %377 = vector.shape_cast %376 : vector<1x32x32xf32> to vector<32x32xf32>
    %c1_124 = arith.constant 1 : index
    %c0_125 = arith.constant 0 : index
    %c0_126 = arith.constant 0 : index
    %378 = vector.load %arg8[%c1_124, %c0_125, %c0_126] : memref<2x1x32xf32, #tpu.memory_space<vmem>>, vector<1x1x32xf32>
    %379 = vector.shape_cast %378 : vector<1x1x32xf32> to vector<1x32xf32>
    %380 = arith.truncf %375 : vector<16x32xf32> to vector<16x32xbf16>
    %381 = arith.truncf %377 : vector<32x32xf32> to vector<32x32xbf16>
    %cst_127 = arith.constant dense<0.000000e+00> : vector<16x32xf32>
    %382 = tpu.matmul %380, %381, %cst_127 {dimension_numbers = #tpu.dot_dimension_numbers<[1], [0], [0], [1], [0, 0, 1, 1], [], []>} : vector<16x32xbf16>, vector<32x32xbf16>, vector<16x32xf32> -> vector<16x32xf32>
    %383 = vector.broadcast %379 : vector<1x32xf32> to vector<16x32xf32>
    %384 = arith.addf %382, %383 : vector<16x32xf32>
    %385 = arith.addf %226, %384 : vector<16x32xf32>
    %c1_128 = arith.constant 1 : index
    %c0_129 = arith.constant 0 : index
    %c0_130 = arith.constant 0 : index
    %386 = vector.load %arg9[%c1_128, %c0_129, %c0_130] : memref<2x1x32xf32, #tpu.memory_space<vmem>>, vector<1x1x32xf32>
    %387 = vector.shape_cast %386 : vector<1x1x32xf32> to vector<1x32xf32>
    %c1_131 = arith.constant 1 : index
    %c0_132 = arith.constant 0 : index
    %c0_133 = arith.constant 0 : index
    %388 = vector.load %arg10[%c1_131, %c0_132, %c0_133] : memref<2x1x32xf32, #tpu.memory_space<vmem>>, vector<1x1x32xf32>
    %389 = vector.shape_cast %388 : vector<1x1x32xf32> to vector<1x32xf32>
    %cst_134 = arith.constant dense<0.000000e+00> : vector<16xf32>
    %390 = vector.multi_reduction <add>, %385, %cst_134 [1] : vector<16x32xf32> to vector<16xf32>
    %391 = vector.shape_cast %390 : vector<16xf32> to vector<16x1xf32>
    %cst_135 = arith.constant 3.200000e+01 : f32
    %392 = vector.broadcast %cst_135 : f32 to vector<16x1xf32>
    %393 = arith.divf %391, %392 : vector<16x1xf32>
    %394 = vector.broadcast %393 : vector<16x1xf32> to vector<16x32xf32>
    %395 = arith.subf %385, %394 : vector<16x32xf32>
    %396 = arith.mulf %395, %395 : vector<16x32xf32>
    %cst_136 = arith.constant dense<0.000000e+00> : vector<16xf32>
    %397 = vector.multi_reduction <add>, %396, %cst_136 [1] : vector<16x32xf32> to vector<16xf32>
    %398 = vector.shape_cast %397 : vector<16xf32> to vector<16x1xf32>
    %cst_137 = arith.constant 0.0322580636 : f32
    %399 = vector.broadcast %cst_137 : f32 to vector<16x1xf32>
    %400 = arith.mulf %398, %399 : vector<16x1xf32>
    %401 = math.sqrt %400 : vector<16x1xf32>
    %402 = vector.broadcast %387 : vector<1x32xf32> to vector<16x32xf32>
    %403 = arith.mulf %402, %395 : vector<16x32xf32>
    %cst_138 = arith.constant 9.99999997E-7 : f32
    %404 = vector.broadcast %cst_138 : f32 to vector<16x1xf32>
    %405 = arith.addf %401, %404 : vector<16x1xf32>
    %406 = vector.broadcast %405 : vector<16x1xf32> to vector<16x32xf32>
    %407 = arith.divf %403, %406 : vector<16x32xf32>
    %408 = vector.broadcast %389 : vector<1x32xf32> to vector<16x32xf32>
    %409 = arith.addf %407, %408 : vector<16x32xf32>
    %c1_139 = arith.constant 1 : index
    %c0_140 = arith.constant 0 : index
    %c0_141 = arith.constant 0 : index
    %410 = vector.load %arg11[%c1_139, %c0_140, %c0_141] : memref<2x32x64xf32, #tpu.memory_space<vmem>>, vector<1x32x64xf32>
    %411 = vector.shape_cast %410 : vector<1x32x64xf32> to vector<32x64xf32>
    %c1_142 = arith.constant 1 : index
    %c0_143 = arith.constant 0 : index
    %c0_144 = arith.constant 0 : index
    %412 = vector.load %arg12[%c1_142, %c0_143, %c0_144] : memref<2x1x64xf32, #tpu.memory_space<vmem>>, vector<1x1x64xf32>
    %413 = vector.shape_cast %412 : vector<1x1x64xf32> to vector<1x64xf32>
    %414 = arith.truncf %409 : vector<16x32xf32> to vector<16x32xbf16>
    %415 = arith.truncf %411 : vector<32x64xf32> to vector<32x64xbf16>
    %cst_145 = arith.constant dense<0.000000e+00> : vector<16x64xf32>
    %416 = tpu.matmul %414, %415, %cst_145 {dimension_numbers = #tpu.dot_dimension_numbers<[1], [0], [0], [1], [0, 0, 1, 1], [], []>} : vector<16x32xbf16>, vector<32x64xbf16>, vector<16x64xf32> -> vector<16x64xf32>
    %417 = vector.broadcast %413 : vector<1x64xf32> to vector<16x64xf32>
    %418 = arith.addf %416, %417 : vector<16x64xf32>
    %cst_146 = arith.constant 0.000000e+00 : f32
    %419 = vector.broadcast %cst_146 : f32 to vector<16x64xf32>
    %420 = arith.maximumf %418, %419 : vector<16x64xf32>
    %c1_147 = arith.constant 1 : index
    %c0_148 = arith.constant 0 : index
    %c0_149 = arith.constant 0 : index
    %421 = vector.load %arg13[%c1_147, %c0_148, %c0_149] : memref<2x64x32xf32, #tpu.memory_space<vmem>>, vector<1x64x32xf32>
    %422 = vector.shape_cast %421 : vector<1x64x32xf32> to vector<64x32xf32>
    %c1_150 = arith.constant 1 : index
    %c0_151 = arith.constant 0 : index
    %c0_152 = arith.constant 0 : index
    %423 = vector.load %arg14[%c1_150, %c0_151, %c0_152] : memref<2x1x32xf32, #tpu.memory_space<vmem>>, vector<1x1x32xf32>
    %424 = vector.shape_cast %423 : vector<1x1x32xf32> to vector<1x32xf32>
    %425 = arith.truncf %420 : vector<16x64xf32> to vector<16x64xbf16>
    %426 = arith.truncf %422 : vector<64x32xf32> to vector<64x32xbf16>
    %cst_153 = arith.constant dense<0.000000e+00> : vector<16x32xf32>
    %427 = tpu.matmul %425, %426, %cst_153 {dimension_numbers = #tpu.dot_dimension_numbers<[1], [0], [0], [1], [0, 0, 1, 1], [], []>} : vector<16x64xbf16>, vector<64x32xbf16>, vector<16x32xf32> -> vector<16x32xf32>
    %428 = vector.broadcast %424 : vector<1x32xf32> to vector<16x32xf32>
    %429 = arith.addf %427, %428 : vector<16x32xf32>
    %430 = arith.addf %385, %429 : vector<16x32xf32>
    %c0_154 = arith.constant 0 : index
    %c0_155 = arith.constant 0 : index
    %431 = vector.load %arg15[%c0_154, %c0_155] : memref<16x32xf32, #tpu.memory_space<vmem>>, vector<16x32xf32>
    tpu.vector_store %arg15[%c0_154, %c0_155], %430 {strides = array<i32>} : memref<16x32xf32, #tpu.memory_space<vmem>>, vector<16x32xf32>,
    return
  }
}

</mosaic_0001>

<bundles_post_ra>
// kernel: transformer_forward.1
= control target key start
LH: loop header
LB: loop body
LE: loop exit
PB: predicated region body
PF: predicated region fallthrough
CT: control target
= control target key end

     0   :  { %20 = vsyncpa [#allocation3], 0  ;;  %s4131_s0 = inlined_call_operand.hbm [shape: f32[16,32], index: 0, kind: input, shape index: {}]   ;;  %s4132_s1 = inlined_call_operand.vmem [shape: f32[1,32], index: 1, kind: input, shape index: {}]   ;;  %s4133_s2 = inlined_call_operand.vmem [shape: f32[1,32], index: 2, kind: input, shape index: {}]   ;;  %s4134_s3 = inlined_call_operand.vmem [shape: f32[2,1,32], index: 3, kind: input, shape index: {}]   ;;  %s4135_s4 = inlined_call_operand.vmem [shape: f32[2,1,32], index: 4, kind: input, shape index: {}]   ;;  %s4136_s5 = inlined_call_operand.vmem [shape: f32[2,32,96], index: 5, kind: input, shape index: {}]   ;;  %s4137_s6 = inlined_call_operand.vmem [shape: f32[2,1,96], index: 6, kind: input, shape index: {}]   ;;  %s4138_s7 = inlined_call_operand.vmem [shape: f32[2,32,32], index: 7, kind: input, shape index: {}]   ;;  %s4139_s8 = inlined_call_operand.vmem [shape: f32[2,1,32], index: 8, kind: input, shape index: {}]   ;;  %s4140_s9 = inlined_call_operand.vmem [shape: f32[2,1,32], index: 9, kind: input, shape index: {}]   ;;  %s4141_s10 = inlined_call_operand.vmem [shape: f32[2,1,32], index: 10, kind: input, shape index: {}]   ;;  %s4142_s11 = inlined_call_operand.vmem [shape: f32[2,32,64], index: 11, kind: input, shape index: {}]   ;;  %s4143_s12 = inlined_call_operand.vmem [shape: f32[2,1,64], index: 12, kind: input, shape index: {}]   ;;  %s4144_s13 = inlined_call_operand.vmem [shape: f32[2,64,32], index: 13, kind: input, shape index: {}]   ;;  %s4145_s14 = inlined_call_operand.hbm [shape: f32[2,1,32], index: 14, kind: input, shape index: {}]   ;;  %s4146_s15 = inlined_call_operand.hbm [shape: f32[16,32], index: 15, kind: output, shape index: {}]  }
   0x1   :  { %21 = vsyncpa [#allocation6], 0 }
   0x2   :  { %22 = vsyncpa [#allocation4], 0  ;;  %s3397_s18 = smov [#allocation2]  }
   0x3   :  { %s28_s19 = sshll.u32 %s3397_s18, 4  ;;  %s29_s19 = int_to_ptr.vmem [resolvable:$true] %s28_s19 }
   0x4   :  { %s3339_s20 = scalar_lea.vmem %s29_s19, 256  ;;  %p3344_p1 = scmp.lt.s32.totalorder %s29_s19, %s29_s19 }
   0x5   :  { %p3340_p0 = scmp.ne.s32.totalorder %s29_s19, %s3339_s20  ;;  %p3345_p2 = scmp.lt.s32.totalorder %s3339_s20, %s3339_s20 }
   0x7   :  { %p3346_p3 = por %p3345_p2, %p3344_p1 }
   0x9   :  { %p3347_p4 = pnand %p3346_p3, %p3340_p0 }
   0xb   :  { %3350 = shalt.err (!%p3347_p4)
}
   0xc   :  { %s4147_s21 = smov 128   ;;  %s4150_s22 = smov 8  }
   0xd   :  { %34 = dma.hbm_to_vmem [thread:$0]  %s4131_s0, 256, %s29_s19, [#allocation3], %s4147_s21, %s4147_s21, %s4150_s22  }
   0xe   :  { %s3400_s25 = smov [#allocation5]  }
   0xf   :  { %s66_s26 = sshll.u32 %s3400_s25, 4  ;;  %s67_s26 = int_to_ptr.vmem [resolvable:$true] %s66_s26 }
  0x10   :  { %s3359_s27 = scalar_lea.vmem %s67_s26, 32  ;;  %p3364_p6 = scmp.lt.s32.totalorder %s67_s26, %s67_s26 }
  0x11   :  { %p3360_p5 = scmp.ne.s32.totalorder %s67_s26, %s3359_s27  ;;  %p3365_p7 = scmp.lt.s32.totalorder %s3359_s27, %s3359_s27 }
  0x13   :  { %p3366_p8 = por %p3365_p7, %p3364_p6 }
  0x15   :  { %p3367_p9 = pnand %p3366_p8, %p3360_p5 }
  0x17   :  { %3370 = shalt.err (!%p3367_p9)
}
  0x18   :  { %s4149_s28 = smov 16   ;;  %s3402_s29 = smov 1  }
  0x19   :  { %72 = dma.hbm_to_vmem [thread:$0]  %s4145_s14, 32, %s67_s26, [#allocation6], %s4149_s28, %s4149_s28, %s3402_s29  }
  0x1a   :  { %3391 = dma.done.wait [#allocation3], 256  }
  0x1b   :  { %3392 = vsyncadd [#allocation3], 4294967040 }
  0x1c   :  { %3393 = dma.done.wait [#allocation6], 32  }
  0x1d   :  { %3394 = vsyncadd [#allocation6], 4294967264  ;;  %vm84_vm0 = vcmask 261120   ;;  %v80_v0 = vld [vmem:[#allocation2] sm:$0xff]  ;;  %v81_v1 = vld [vmem:[#allocation2 + $0x8] sm:$0xff]  ;;  %v3403_v55 = vmov 0.0  }
  0x1e   :  { %v85_v2 = vsel %vm84_vm0, %v80_v0, 0.0  ;;  %v88_v3 = vsel %vm84_vm0, %v81_v1, 0.0  ;;  %v2735_v30 = vld [vmem:[%s4132_s1] ss:$0 sm:$0xff]  ;;  %v202_v52 = vld [vmem:[%s4136_s5 + $0x10] sm:$0xff]  ;;  %v203_v53 = vld [vmem:[%s4136_s5 + $0x18] sm:$0xff]  ;;  %2912 = vmatprep.subr.bf16.mxu1 %v3403_v55  ;;  %2926 = vmatprep.subr.bf16.mxu0 %v3403_v55 }
  0x1f   :  { %86 = vadd.xlane.f32.xlu0 %v85_v2  ;;  %v2736_v33 = vld [vmem:[%s4133_s2] ss:$0 sm:$0xff]  ;;  %v207_v56 = vpack.c.bf16 %v203_v53, %v202_v52  ;;  %v201_v57 = vld [vmem:[%s4136_s5 + $0x8] sm:$0xff]  ;;  %vm3404_vm5 = vmmov 0   ;;  %s3405_s17 = smov 88   ;;  %s3406_s18 = smov 96  }
  0x20   :  { %v200_v54 = vld [vmem:[%s4136_s5] sm:$0xff]  ;;  %2916 = vmatprep.mubr.msk.bf16.mxu1 %vm3404_vm5, %v3403_v55  ;;  %2928 = vmatprep.mubr.msk.bf16.mxu0 %vm3404_vm5, %v3403_v55  ;;  %s3407_s1 = smov 80   ;;  %s3408_s2 = smov 72   ;;  %vm262_vm10 = vcmask 64512   ;;  %vm513_vm11 = vcmask 1043456   ;;  %vm717_vm12 = vcmask 130048  }
  0x21   :  { %2913 = vmatpush3.bf16.msra.mxu1 %v207_v56  ;;  %v206_v58 = vpack.c.bf16 %v201_v57, %v200_v54  ;;  %s3409_s19 = smov 120   ;;  %s3410_s20 = smov 104   ;;  %vm719_vm13 = vcmask 195584  }
  0x22   :  { %2914 = vmatprep.subr.bf16.mxu1 %v3403_v55  ;;  %s3411_s23 = smov 112   ;;  %s3412_s24 = smov 64  }
  0x23   :  { %89 = vadd.xlane.f32.xlu0 %v88_v3  ;;  %s3413_s25 = smov 48   ;;  %s3414_s26 = smov 40  }
  0x24   :  { %s3415_s27 = smov 56   ;;  %s4148_s0 = smov 24  }
  0x25   :  { %2915 = vmatpush3.bf16.msra.mxu1 %v206_v58 }
  0x26   :  { %2920 = vmatprep.subr.bf16.mxu1 %v3403_v55 }
  0xa8   :  { %v87_v4 = vpop.xlane.xlu0 %86 }
  0xa9   :  { %v92_v5 = vmul.f32 0.03125, %v87_v4 }
  0xab   :  { %v94_v6 = vsub.f32 %v80_v0, %v92_v5 }
  0xac   :  { %v90_v7 = vpop.xlane.xlu0 %89 }
  0xad   :  { %v93_v8 = vmul.f32 0.03125, %v90_v7  ;;  %v96_v9 = vmul.f32 %v94_v6, %v94_v6  ;;  %v126_v31 = vmul.f32 %v2735_v30, %v94_v6 }
  0xaf   :  { %v95_v10 = vsub.f32 %v81_v1, %v93_v8  ;;  %v98_v11 = vsel %vm84_vm0, %v96_v9, 0.0 }
  0xb0   :  { %99 = vadd.xlane.f32.xlu1 %v98_v11  ;;  %v2737_v11 = vld [vmem:[%s4134_s3] ss:$0 sm:$0xff] }
  0xb1   :  { %v97_v12 = vmul.f32 %v95_v10, %v95_v10  ;;  %v127_v35 = vmul.f32 %v2735_v30, %v95_v10 }
  0xb3   :  { %v101_v13 = vsel %vm84_vm0, %v97_v12, 0.0 }
  0xb4   :  { %102 = vadd.xlane.f32.xlu1 %v101_v13 }
 0x139   :  { %v100_v14 = vpop.xlane.xlu1 %99 }
 0x13a   :  { %v104_v15 = vmul.f32 0.032258064, %v100_v14 }
 0x13c   :  { %3227 = vrsqrt.f32 %v104_v15  ;;  %vm108_vm1 = vcmp.eq.f32.partialorder %v104_v15, inf  ;;  %v111_v20 = vand.u32 2147483648, %v104_v15  ;;  %vm110_vm2 = vcmp.eq.f32.partialorder %v104_v15, 0.0 }
 0x13d   :  { %v103_v16 = vpop.xlane.xlu1 %102 }
 0x13e   :  { %v105_v17 = vmul.f32 0.032258064, %v103_v16 }
 0x140   :  { %3229 = vrsqrt.f32 %v105_v17  ;;  %vm115_vm3 = vcmp.eq.f32.partialorder %v105_v17, inf  ;;  %v118_v26 = vand.u32 2147483648, %v105_v17  ;;  %vm117_vm4 = vcmp.eq.f32.partialorder %v105_v17, 0.0 }
 0x149   :  { %v3228_v18 = vpop.eup %3227 }
 0x14a   :  { %v107_v19 = vmul.f32 %v3228_v18, %v104_v15 }
 0x14c   :  { %v109_v21 = vsel %vm108_vm1, %v104_v15, %v107_v19 }
 0x14d   :  { %v3230_v22 = vpop.eup %3229  ;;  %v112_v23 = vsel %vm110_vm2, %v111_v20, %v109_v21 }
 0x14e   :  { %v114_v24 = vmul.f32 %v3230_v22, %v105_v17  ;;  %v128_v25 = vadd.f32 1e-06, %v112_v23  ;;  %v2739_v22 = vld [vmem:[%s4137_s6] ss:$0 sm:$0xff] }
 0x150   :  { %v116_v27 = vsel %vm115_vm3, %v105_v17, %v114_v24  ;;  %3231 = vrcp.f32 %v128_v25  ;;  %v2738_v17 = vld [vmem:[%s4135_s4] ss:$0 sm:$0xff]  ;;  %vm1378_vm3 = vcmask 523264  }
 0x151   :  { %v119_v28 = vsel %vm117_vm4, %v118_v26, %v116_v27 }
 0x152   :  { %v129_v29 = vadd.f32 1e-06, %v119_v28 }
 0x154   :  { %3233 = vrcp.f32 %v129_v29 }
 0x15d   :  { %v3232_v32 = vpop.eup %3231 }
 0x15e   :  { %v131_v34 = vmul.f32 %v3232_v32, %v126_v31 }
 0x160   :  { %v3519_v36 = vadd.f32 %v2736_v33, %v131_v34 }
 0x161   :  { %v3234_v37 = vpop.eup %3233 }
 0x162   :  { %v144_v38 = vsel %vm84_vm0, %v3519_v36, 0.0  ;;  %v133_v39 = vmul.f32 %v3234_v37, %v127_v35 }
 0x163   :  { %145 = vadd.xlane.f32.xlu0 %v144_v38 }
 0x164   :  { %v3523_v40 = vadd.f32 %v2736_v33, %v133_v39 }
 0x166   :  { %v147_v41 = vsel %vm84_vm0, %v3523_v40, 0.0 }
 0x167   :  { %148 = vadd.xlane.f32.xlu1 %v147_v41 }
 0x1ec   :  { %v146_v42 = vpop.xlane.xlu0 %145 }
 0x1ed   :  { %v150_v43 = vmul.f32 0.03125, %v146_v42 }
 0x1ef   :  { %v152_v44 = vsub.f32 %v3519_v36, %v150_v43 }
 0x1f0   :  { %v149_v45 = vpop.xlane.xlu1 %148 }
 0x1f1   :  { %v151_v46 = vmul.f32 0.03125, %v149_v45  ;;  %v154_v47 = vmul.f32 %v152_v44, %v152_v44  ;;  %v184_v13 = vmul.f32 %v2737_v11, %v152_v44 }
 0x1f3   :  { %v153_v48 = vsub.f32 %v3523_v40, %v151_v46  ;;  %v156_v49 = vsel %vm84_vm0, %v154_v47, 0.0 }
 0x1f4   :  { %157 = vadd.xlane.f32.xlu0 %v156_v49 }
 0x1f5   :  { %v155_v50 = vmul.f32 %v153_v48, %v153_v48  ;;  %v185_v14 = vmul.f32 %v2737_v11, %v153_v48 }
 0x1f7   :  { %v159_v51 = vsel %vm84_vm0, %v155_v50, 0.0 }
 0x1f8   :  { %160 = vadd.xlane.f32.xlu1 %v159_v51 }
 0x27d   :  { %v158_v59 = vpop.xlane.xlu0 %157 }
 0x27e   :  { %v162_v60 = vmul.f32 0.032258064, %v158_v59 }
 0x280   :  { %3235 = vrsqrt.f32 %v162_v60  ;;  %vm166_vm6 = vcmp.eq.f32.partialorder %v162_v60, inf  ;;  %v169_v1 = vand.u32 2147483648, %v162_v60  ;;  %vm168_vm7 = vcmp.eq.f32.partialorder %v162_v60, 0.0 }
 0x281   :  { %v161_v61 = vpop.xlane.xlu1 %160 }
 0x282   :  { %v163_v62 = vmul.f32 0.032258064, %v161_v61 }
 0x284   :  { %3237 = vrsqrt.f32 %v163_v62  ;;  %vm173_vm8 = vcmp.eq.f32.partialorder %v163_v62, inf  ;;  %v176_v7 = vand.u32 2147483648, %v163_v62  ;;  %vm175_vm9 = vcmp.eq.f32.partialorder %v163_v62, 0.0 }
 0x28d   :  { %v3236_v63 = vpop.eup %3235 }
 0x28e   :  { %v165_v0 = vmul.f32 %v3236_v63, %v162_v60 }
 0x290   :  { %v167_v2 = vsel %vm166_vm6, %v162_v60, %v165_v0 }
 0x291   :  { %v3238_v3 = vpop.eup %3237  ;;  %v170_v4 = vsel %vm168_vm7, %v169_v1, %v167_v2 }
 0x292   :  { %v186_v5 = vadd.f32 1e-06, %v170_v4  ;;  %v172_v6 = vmul.f32 %v3238_v3, %v163_v62 }
 0x294   :  { %3239 = vrcp.f32 %v186_v5  ;;  %v174_v8 = vsel %vm173_vm8, %v163_v62, %v172_v6 }
 0x295   :  { %v177_v9 = vsel %vm175_vm9, %v176_v7, %v174_v8 }
 0x296   :  { %v187_v10 = vadd.f32 1e-06, %v177_v9 }
 0x298   :  { %3241 = vrcp.f32 %v187_v10 }
 0x2a1   :  { %v3240_v12 = vpop.eup %3239 }
 0x2a2   :  { %v189_v15 = vmul.f32 %v3240_v12, %v184_v13 }
 0x2a4   :  { %v198_v19 = vadd.f32 %v2738_v17, %v189_v15 }
 0x2a5   :  { %v3242_v16 = vpop.eup %3241 }
 0x2a6   :  { %v191_v18 = vmul.f32 %v3242_v16, %v185_v14 }
 0x2a8   :  { %v199_v20 = vadd.f32 %v2738_v17, %v191_v18 }
 0x2aa   :  { %v205_v21 = vpack.c.bf16 %v199_v20, %v198_v19 }
 0x2ac   :  { %2917 = vmatmul.mubr.msk.bf16.vlgmr.msra.gmra.mxu1 %vm84_vm0, %v205_v21 }
 0x2ad   :  { %2922 = vmatprep.mubr.msk.bf16.mxu1 %vm3404_vm5, %v3403_v55 }
 0x36c   :  { %v251_v23 = vpop.f32.mrf.mxu1 }
 0x36d   :  { %v252_v24 = vadd.f32 %v2739_v22, %v251_v23 }
 0x36e   :  { %v2918_v25 = vpop.f32.mrf.mxu1 }
 0x36f   :  { %v3563_v26 = vpack.c.bf16 %v252_v24, %v252_v24 }
 0x370   :  { %v254_v27 = vpop.f32.mrf.mxu1 }
 0x371   :  { %v3565_v28 = vadd.f32 %v2739_v22, %v254_v27  ;;  %311 = vrot.lane.b32.xlu1 %v3563_v26, %s3405_s17  ;;  %260 = vrot.lane.b32.xlu0 %v3563_v26, %s3406_s18 }
 0x372   :  { %v2919_v29 = vpop.f32.mrf.mxu1 }
 0x373   :  { %v3620_v17 = vpack.c.bf16 %v3565_v28, %v3565_v28 }
 0x375   :  { %361 = vrot.lane.b32.xlu1 %v3563_v26, %s3407_s1  ;;  %411 = vrot.lane.b32.xlu0 %v3563_v26, %s3408_s2 }
 0x379   :  { %309 = vrot.lane.b32.xlu1 %v3563_v26, %s3409_s19  ;;  %409 = vrot.lane.b32.xlu0 %v3563_v26, %s3410_s20 }
 0x37d   :  { %359 = vrot.lane.b32.xlu1 %v3563_v26, %s3411_s23 }
 0x3e3   :  { %v312_v30 = vpop.permute.xlu1 %311  ;;  %v261_v31 = vpop.permute.xlu0 %260 }
 0x3e4   :  { %v267_v32 = vsel %vm262_vm10, %v261_v31, 0  ;;  %v317_v33 = vsel %vm262_vm10, %v312_v30, 0 }
 0x3e5   :  { %2921 = vmatpush3.bf16.xpose.msra.mxu1 %v267_v32  ;;  %2927 = vmatpush3.bf16.xpose.msra.mxu0 %v317_v33 }
 0x3e6   :  { %2932 = vmatprep.subr.bf16.mxu1 %v3403_v55  ;;  %2938 = vmatprep.subr.bf16.mxu0 %v3403_v55 }
 0x3e7   :  { %v362_v34 = vpop.permute.xlu1 %361  ;;  %v412_v35 = vpop.permute.xlu0 %411 }
 0x3e8   :  { %v367_v38 = vsel %vm262_vm10, %v362_v34, 0  ;;  %v417_v39 = vsel %vm262_vm10, %v412_v35, 0 }
 0x3eb   :  { %v310_v37 = vpop.permute.xlu1 %309  ;;  %v410_v41 = vpop.permute.xlu0 %409 }
 0x3ec   :  { %2923 = vmatmul.mubr.msk.bf16.vlgmr.msra.gmra.mxu1 %vm262_vm10, %v3563_v26  ;;  %2929 = vmatmul.mubr.msk.bf16.vlgmr.msra.gmra.mxu0 %vm262_vm10, %v310_v37 }
 0x3ed   :  { %2933 = vmatpush3.bf16.xpose.msra.mxu1 %v367_v38  ;;  %2939 = vmatpush3.bf16.xpose.msra.mxu0 %v417_v39 }
 0x3ee   :  { %2934 = vmatprep.mubr.msk.bf16.mxu1 %vm3404_vm5, %v3403_v55  ;;  %2940 = vmatprep.mubr.msk.bf16.mxu0 %vm3404_vm5, %v3403_v55 }
 0x3ef   :  { %2944 = vmatprep.subr.bf16.mxu1 %v3403_v55  ;;  %2950 = vmatprep.subr.bf16.mxu0 %v3403_v55  ;;  %v360_v42 = vpop.permute.xlu1 %359 }
 0x3f4   :  { %2935 = vmatmul.mubr.msk.bf16.vlgmr.msra.gmra.mxu1 %vm262_vm10, %v360_v42  ;;  %2941 = vmatmul.mubr.msk.bf16.vlgmr.msra.gmra.mxu0 %vm262_vm10, %v410_v41 }
 0x3f5   :  { %2946 = vmatprep.mubr.msk.bf16.mxu1 %vm3404_vm5, %v3403_v55  ;;  %2952 = vmatprep.mubr.msk.bf16.mxu0 %vm3404_vm5, %v3403_v55 }
 0x4ac   :  { %v303_v43 = vpop.f32.mrf.mxu1  ;;  %v353_v44 = vpop.f32.mrf.mxu0 }
 0x4ad   :  { %v459_v45 = vmul.f32 0.35355338, %v303_v43  ;;  %v460_v46 = vmul.f32 0.35355338, %v353_v44 }
 0x4ae   :  { %v2924_v47 = vpop.f32.mrf.mxu1  ;;  %v2930_v48 = vpop.f32.mrf.mxu0 }
 0x4af   :  { %v466_v49 = vsel %vm262_vm10, %v460_v46, -inf  ;;  %v463_v50 = vsel %vm262_vm10, %v459_v45, -inf }
 0x4b0   :  { %v356_v51 = vpop.f32.mrf.mxu0  ;;  %467 = vmax.xlane.f32.xlu0 %v466_v49  ;;  %464 = vmax.xlane.f32.xlu1 %v463_v50  ;;  %v306_v52 = vpop.f32.mrf.mxu1 }
 0x4b2   :  { %v2925_v53 = vpop.f32.mrf.mxu1  ;;  %v2931_v54 = vpop.f32.mrf.mxu0 }
 0x4b4   :  { %v403_v56 = vpop.f32.mrf.mxu1  ;;  %v453_v57 = vpop.f32.mrf.mxu0 }
 0x4b5   :  { %v461_v58 = vmul.f32 0.35355338, %v403_v56  ;;  %v462_v61 = vmul.f32 0.35355338, %v453_v57 }
 0x4b6   :  { %v2936_v59 = vpop.f32.mrf.mxu1  ;;  %v2942_v60 = vpop.f32.mrf.mxu0 }
 0x4b7   :  { %v469_v62 = vsel %vm262_vm10, %v461_v58, -inf  ;;  %v472_v3 = vsel %vm262_vm10, %v462_v61, -inf }
 0x4b8   :  { %v456_v63 = vpop.f32.mrf.mxu0  ;;  %470 = vmax.xlane.f32.xlu0 %v469_v62  ;;  %v406_v0 = vpop.f32.mrf.mxu1 }
 0x4ba   :  { %v2937_v1 = vpop.f32.mrf.mxu1  ;;  %v2943_v2 = vpop.f32.mrf.mxu0 }
 0x4bc   :  { %473 = vmax.xlane.f32.xlu0 %v472_v3 }
 0x4c1   :  { %508 = vrot.lane.b32.xlu1 %v3563_v26, %s3412_s24 }
 0x539   :  { %v468_v4 = vpop.xlane.xlu0 %467  ;;  %v465_v5 = vpop.xlane.xlu1 %464 }
 0x53a   :  { %v476_v6 = vsub.f32 %v460_v46, %v468_v4  ;;  %v475_v7 = vsub.f32 %v459_v45, %v465_v5 }
 0x53c   :  { %v481_v8 = vmul.f32 1.442695, %v476_v6  ;;  %v479_v9 = vmul.f32 1.442695, %v475_v7 }
 0x53d   :  { %v509_v10 = vpop.permute.xlu1 %508 }
 0x53e   :  { %3243 = vpow2.f32 %v481_v8  ;;  %v515_v11 = vsel %vm513_vm11, %v509_v10, 0 }
 0x53f   :  { %3245 = vpow2.f32 %v479_v9  ;;  %2945 = vmatpush3.bf16.msra.mxu1 %v515_v11 }
 0x540   :  { %2956 = vmatprep.subr.bf16.mxu1 %v3403_v55 }
 0x541   :  { %v471_v16 = vpop.xlane.xlu0 %470 }
 0x542   :  { %v477_v21 = vsub.f32 %v461_v58, %v471_v16 }
 0x544   :  { %v483_v22 = vmul.f32 1.442695, %v477_v21 }
 0x545   :  { %v474_v18 = vpop.xlane.xlu0 %473 }
 0x546   :  { %v478_v19 = vsub.f32 %v462_v61, %v474_v18 }
 0x548   :  { %v485_v20 = vmul.f32 1.442695, %v478_v19 }
 0x54a   :  { %3247 = vpow2.f32 %v485_v20 }
 0x54b   :  { %v3244_v12 = vpop.eup %3243  ;;  %3249 = vpow2.f32 %v483_v22 }
 0x54c   :  { %v3246_v13 = vpop.eup %3245  ;;  %v490_v14 = vsel %vm262_vm10, %v3244_v12, 0.0 }
 0x54d   :  { %v487_v15 = vsel %vm262_vm10, %v3246_v13, 0.0  ;;  %491 = vadd.xlane.f32.xlu0 %v490_v14 }
 0x54e   :  { %488 = vadd.xlane.f32.xlu1 %v487_v15 }
 0x557   :  { %v3248_v23 = vpop.eup %3247 }
 0x558   :  { %v496_v24 = vsel %vm262_vm10, %v3248_v23, 0.0  ;;  %v3250_v25 = vpop.eup %3249 }
 0x55f   :  { %607 = vrot.lane.b32.xlu1 %v3563_v26, %s3413_s25 }
 0x563   :  { %656 = vrot.lane.b32.xlu1 %v3563_v26, %s3414_s26  ;;  %558 = vrot.lane.b32.xlu0 %v3563_v26, %s3415_s27  ;;  %v493_v26 = vsel %vm262_vm10, %v3250_v25, 0.0 }
 0x567   :  { %723 = vrot.lane.b32.xlu1 %v3620_v17, %s3406_s18 }
 0x582   :  { %497 = vadd.xlane.f32.xlu0 %v496_v24 }
 0x58b   :  { %494 = vadd.xlane.f32.xlu1 %v493_v26 }
 0x598   :  { %773 = vrot.lane.b32.xlu0 %v3620_v17, %s3405_s17 }
 0x59c   :  { %823 = vrot.lane.b32.xlu1 %v3620_v17, %s3407_s1  ;;  %771 = vrot.lane.b32.xlu0 %v3620_v17, %s3409_s19 }
 0x5a0   :  { %873 = vrot.lane.b32.xlu1 %v3620_v17, %s3408_s2  ;;  %821 = vrot.lane.b32.xlu0 %v3620_v17, %s3411_s23 }
 0x5a4   :  { %871 = vrot.lane.b32.xlu1 %v3620_v17, %s3410_s20 }
 0x5d6   :  { %v492_v27 = vpop.xlane.xlu0 %491 }
 0x5d7   :  { %v489_v28 = vpop.xlane.xlu1 %488  ;;  %3251 = vrcp.f32 %v492_v27 }
 0x5d8   :  { %3253 = vrcp.f32 %v489_v28 }
 0x5da   :  { %v559_v29 = vpop.permute.xlu0 %558 }
 0x5db   :  { %v564_v30 = vsel %vm513_vm11, %v559_v29, 0  ;;  %v608_v31 = vpop.permute.xlu1 %607 }
 0x5dc   :  { %2951 = vmatpush3.bf16.msra.mxu0 %v564_v30  ;;  %v613_v42 = vsel %vm513_vm11, %v608_v31, 0 }
 0x5dd   :  { %2962 = vmatprep.subr.bf16.mxu0 %v3403_v55 }
 0x5df   :  { %v657_v35 = vpop.permute.xlu1 %656 }
 0x5e0   :  { %v662_v41 = vsel %vm513_vm11, %v657_v35, 0 }
 0x5e3   :  { %v724_v44 = vpop.permute.xlu1 %723 }
 0x5e4   :  { %v3252_v32 = vpop.eup %3251  ;;  %v729_v59 = vsel %vm262_vm10, %v724_v44, 0 }
 0x5e5   :  { %v3254_v33 = vpop.eup %3253  ;;  %v502_v34 = vmul.f32 %v3252_v32, %v3244_v12 }
 0x5e6   :  { %v500_v37 = vmul.f32 %v3254_v33, %v3246_v13 }
 0x5e7   :  { %v557_v38 = vpack.c.bf16 %v502_v34, %v502_v34 }
 0x5e8   :  { %v507_v39 = vpack.c.bf16 %v500_v37, %v500_v37 }
 0x5e9   :  { %2953 = vmatmul.mubr.msk.bf16.vlgmr.msra.gmra.mxu0 %vm262_vm10, %v557_v38 }
 0x5ea   :  { %2947 = vmatmul.mubr.msk.bf16.vlgmr.msra.gmra.mxu1 %vm262_vm10, %v507_v39  ;;  %2963 = vmatpush3.bf16.msra.mxu0 %v662_v41 }
 0x5eb   :  { %2957 = vmatpush3.bf16.msra.mxu1 %v613_v42  ;;  %2964 = vmatprep.mubr.msk.bf16.mxu0 %vm3404_vm5, %v3403_v55 }
 0x5ec   :  { %2974 = vmatprep.subr.bf16.mxu0 %v3403_v55  ;;  %2958 = vmatprep.mubr.msk.bf16.mxu1 %vm3404_vm5, %v3403_v55 }
 0x5ed   :  { %2968 = vmatprep.subr.bf16.mxu1 %v3403_v55 }
 0x60b   :  { %v498_v43 = vpop.xlane.xlu0 %497 }
 0x60c   :  { %3255 = vrcp.f32 %v498_v43 }
 0x60f   :  { %v774_v48 = vpop.permute.xlu0 %773 }
 0x610   :  { %v779_v51 = vsel %vm262_vm10, %v774_v48, 0 }
 0x613   :  { %v772_v56 = vpop.permute.xlu0 %771 }
 0x614   :  { %v495_v45 = vpop.xlane.xlu1 %494 }
 0x615   :  { %3257 = vrcp.f32 %v495_v45 }
 0x617   :  { %v822_v62 = vpop.permute.xlu0 %821 }
 0x618   :  { %v824_v50 = vpop.permute.xlu1 %823 }
 0x619   :  { %v3256_v46 = vpop.eup %3255  ;;  %v829_v61 = vsel %vm262_vm10, %v824_v50, 0 }
 0x61a   :  { %v506_v47 = vmul.f32 %v3256_v46, %v3248_v23 }
 0x61c   :  { %v655_v49 = vpack.c.bf16 %v506_v47, %v506_v47  ;;  %v874_v53 = vpop.permute.xlu1 %873 }
 0x61d   :  { %v879_v58 = vsel %vm262_vm10, %v874_v53, 0 }
 0x61e   :  { %2965 = vmatmul.mubr.msk.bf16.vlgmr.msra.gmra.mxu0 %vm262_vm10, %v655_v49 }
 0x61f   :  { %2975 = vmatpush3.bf16.xpose.msra.mxu0 %v779_v51  ;;  %2976 = vmatprep.mubr.msk.bf16.mxu0 %vm3404_vm5, %v3403_v55 }
 0x620   :  { %2986 = vmatprep.subr.bf16.mxu0 %v3403_v55  ;;  %v872_v60 = vpop.permute.xlu1 %871 }
 0x622   :  { %v3258_v52 = vpop.eup %3257 }
 0x623   :  { %v504_v54 = vmul.f32 %v3258_v52, %v3250_v25 }
 0x625   :  { %v606_v57 = vpack.c.bf16 %v504_v54, %v504_v54 }
 0x626   :  { %2977 = vmatmul.mubr.msk.bf16.vlgmr.msra.gmra.mxu0 %vm262_vm10, %v772_v56 }
 0x627   :  { %2959 = vmatmul.mubr.msk.bf16.vlgmr.msra.gmra.mxu1 %vm262_vm10, %v606_v57  ;;  %2987 = vmatpush3.bf16.xpose.msra.mxu0 %v879_v58 }
 0x628   :  { %2969 = vmatpush3.bf16.xpose.msra.mxu1 %v729_v59  ;;  %2970 = vmatprep.mubr.msk.bf16.mxu1 %vm3404_vm5, %v3403_v55 }
 0x629   :  { %2980 = vmatprep.subr.bf16.mxu1 %v3403_v55  ;;  %2988 = vmatprep.mubr.msk.bf16.mxu0 %vm3404_vm5, %v3403_v55 }
 0x62a   :  { %2998 = vmatprep.subr.bf16.mxu0 %v3403_v55 }
 0x62e   :  { %2989 = vmatmul.mubr.msk.bf16.vlgmr.msra.gmra.mxu0 %vm262_vm10, %v872_v60 }
 0x62f   :  { %2971 = vmatmul.mubr.msk.bf16.vlgmr.msra.gmra.mxu1 %vm262_vm10, %v3620_v17  ;;  %3000 = vmatprep.mubr.msk.bf16.mxu0 %vm3404_vm5, %v3403_v55 }
 0x630   :  { %2981 = vmatpush3.bf16.xpose.msra.mxu1 %v829_v61  ;;  %2982 = vmatprep.mubr.msk.bf16.mxu1 %vm3404_vm5, %v3403_v55 }
 0x631   :  { %2992 = vmatprep.subr.bf16.mxu1 %v3403_v55 }
 0x637   :  { %2983 = vmatmul.mubr.msk.bf16.vlgmr.msra.gmra.mxu1 %vm262_vm10, %v822_v62 }
 0x638   :  { %2994 = vmatprep.mubr.msk.bf16.mxu1 %vm3404_vm5, %v3403_v55 }
 0x6a9   :  { %v3677_v63 = vpop.f32.mrf.mxu0 }
 0x6aa   :  { %v3679_v0 = vpop.f32.mrf.mxu1 }
 0x6ab   :  { %v2954_v1 = vpop.f32.mrf.mxu0 }
 0x6ac   :  { %v2948_v2 = vpop.f32.mrf.mxu1 }
 0x6ad   :  { %v603_v3 = vpop.f32.mrf.mxu0 }
 0x6ae   :  { %v554_v4 = vpop.f32.mrf.mxu1 }
 0x6af   :  { %v2955_v5 = vpop.f32.mrf.mxu0 }
 0x6b0   :  { %v2949_v6 = vpop.f32.mrf.mxu1 }
 0x6de   :  { %v3681_v7 = vpop.f32.mrf.mxu0 }
 0x6e0   :  { %v2966_v8 = vpop.f32.mrf.mxu0 }
 0x6e2   :  { %v701_v9 = vpop.f32.mrf.mxu0 }
 0x6e4   :  { %v2967_v10 = vpop.f32.mrf.mxu0 }
 0x6e6   :  { %v815_v11 = vpop.f32.mrf.mxu0 }
 0x6e7   :  { %v3683_v12 = vpop.f32.mrf.mxu1  ;;  %v922_v13 = vmul.f32 0.35355338, %v815_v11 }
 0x6e8   :  { %v2978_v14 = vpop.f32.mrf.mxu0 }
 0x6e9   :  { %v2960_v15 = vpop.f32.mrf.mxu1  ;;  %v928_v16 = vsel %vm262_vm10, %v922_v13, -inf }
 0x6ea   :  { %929 = vmax.xlane.f32.xlu1 %v928_v16  ;;  %v818_v18 = vpop.f32.mrf.mxu0 }
 0x6eb   :  { %v652_v19 = vpop.f32.mrf.mxu1 }
 0x6ec   :  { %v2979_v20 = vpop.f32.mrf.mxu0 }
 0x6ed   :  { %v2961_v21 = vpop.f32.mrf.mxu1 }
 0x6ee   :  { %v915_v22 = vpop.f32.mrf.mxu0 }
 0x6ef   :  { %v765_v23 = vpop.f32.mrf.mxu1  ;;  %v924_v35 = vmul.f32 0.35355338, %v915_v22 }
 0x6f0   :  { %v921_v24 = vmul.f32 0.35355338, %v765_v23  ;;  %v2990_v25 = vpop.f32.mrf.mxu0 }
 0x6f1   :  { %v2972_v26 = vpop.f32.mrf.mxu1  ;;  %v934_v41 = vsel %vm262_vm10, %v924_v35, -inf }
 0x6f2   :  { %v918_v27 = vpop.f32.mrf.mxu0  ;;  %v925_v28 = vsel %vm262_vm10, %v921_v24, -inf }
 0x6f3   :  { %926 = vmax.xlane.f32.xlu0 %v925_v28  ;;  %v768_v29 = vpop.f32.mrf.mxu1 }
 0x6f4   :  { %v2991_v30 = vpop.f32.mrf.mxu0 }
 0x6f5   :  { %v2973_v31 = vpop.f32.mrf.mxu1 }
 0x6f7   :  { %v865_v32 = vpop.f32.mrf.mxu1 }
 0x6f8   :  { %v923_v33 = vmul.f32 0.35355338, %v865_v32 }
 0x6f9   :  { %v2984_v34 = vpop.f32.mrf.mxu1 }
 0x6fa   :  { %v931_v37 = vsel %vm262_vm10, %v923_v33, -inf  ;;  %v1183_v34 = vld [vmem:[%s4138_s7 + $0x18] sm:$0xff] }
 0x6fb   :  { %932 = vmax.xlane.f32.xlu0 %v931_v37  ;;  %v868_v38 = vpop.f32.mrf.mxu1 }
 0x6fd   :  { %v2985_v39 = vpop.f32.mrf.mxu1 }
 0x6ff   :  { %935 = vmax.xlane.f32.xlu0 %v934_v41 }
 0x773   :  { %v930_v42 = vpop.xlane.xlu1 %929 }
 0x774   :  { %v938_v43 = vsub.f32 %v922_v13, %v930_v42 }
 0x776   :  { %v943_v44 = vmul.f32 1.442695, %v938_v43 }
 0x778   :  { %3259 = vpow2.f32 %v943_v44 }
 0x77c   :  { %v927_v45 = vpop.xlane.xlu0 %926 }
 0x77d   :  { %v937_v46 = vsub.f32 %v921_v24, %v927_v45  ;;  %v1180_v45 = vld [vmem:[%s4138_s7] sm:$0xff] }
 0x77f   :  { %v941_v47 = vmul.f32 1.442695, %v937_v46  ;;  %v1181_v46 = vld [vmem:[%s4138_s7 + $0x8] sm:$0xff] }
 0x781   :  { %3261 = vpow2.f32 %v941_v47  ;;  %v1186_v47 = vpack.c.bf16 %v1181_v46, %v1180_v45 }
 0x784   :  { %v933_v48 = vpop.xlane.xlu0 %932 }
 0x785   :  { %v3260_v49 = vpop.eup %3259  ;;  %v939_v50 = vsub.f32 %v923_v33, %v933_v48  ;;  %v1182_v33 = vld [vmem:[%s4138_s7 + $0x10] sm:$0xff] }
 0x786   :  { %v952_v51 = vsel %vm262_vm10, %v3260_v49, 0.0 }
 0x787   :  { %v945_v52 = vmul.f32 1.442695, %v939_v50  ;;  %953 = vadd.xlane.f32.xlu1 %v952_v51 }
 0x788   :  { %v936_v58 = vpop.xlane.xlu0 %935 }
 0x789   :  { %3263 = vpow2.f32 %v945_v52  ;;  %v940_v59 = vsub.f32 %v924_v35, %v936_v58  ;;  %v1187_v35 = vpack.c.bf16 %v1183_v34, %v1182_v33  ;;  %v1365_v33 = vld [vmem:[%s4144_s13 + $0x38] sm:$0xff] }
 0x78b   :  { %v947_v60 = vmul.f32 1.442695, %v940_v59 }
 0x78d   :  { %3265 = vpow2.f32 %v947_v60 }
 0x78e   :  { %v3262_v53 = vpop.eup %3261 }
 0x78f   :  { %v949_v54 = vsel %vm262_vm10, %v3262_v53, 0.0 }
 0x790   :  { %950 = vadd.xlane.f32.xlu0 %v949_v54 }
 0x796   :  { %v3264_v56 = vpop.eup %3263 }
 0x797   :  { %v955_v57 = vsel %vm262_vm10, %v3264_v56, 0.0 }
 0x798   :  { %956 = vadd.xlane.f32.xlu0 %v955_v57  ;;  %1019 = vrot.lane.b32.xlu1 %v3620_v17, %s3415_s27 }
 0x79a   :  { %v3266_v61 = vpop.eup %3265 }
 0x79b   :  { %v958_v62 = vsel %vm262_vm10, %v3266_v61, 0.0 }
 0x79c   :  { %1068 = vrot.lane.b32.xlu1 %v3620_v17, %s3413_s25 }
 0x7ae   :  { %970 = vrot.lane.b32.xlu0 %v3620_v17, %s3412_s24 }
 0x7c0   :  { %959 = vadd.xlane.f32.xlu1 %v958_v62 }
 0x7d1   :  { %1117 = vrot.lane.b32.xlu1 %v3620_v17, %s3414_s26 }
 0x810   :  { %v954_v1 = vpop.xlane.xlu1 %953 }
 0x811   :  { %3267 = vrcp.f32 %v954_v1 }
 0x814   :  { %v1020_v2 = vpop.permute.xlu1 %1019 }
 0x815   :  { %v1025_v3 = vsel %vm513_vm11, %v1020_v2, 0 }
 0x816   :  { %2999 = vmatpush3.bf16.msra.mxu0 %v1025_v3 }
 0x817   :  { %3010 = vmatprep.subr.bf16.mxu0 %v3403_v55 }
 0x818   :  { %v1069_v14 = vpop.permute.xlu1 %1068 }
 0x819   :  { %v951_v4 = vpop.xlane.xlu0 %950  ;;  %v1074_v16 = vsel %vm513_vm11, %v1069_v14, 0 }
 0x81a   :  { %3269 = vrcp.f32 %v951_v4 }
 0x81e   :  { %v3268_v5 = vpop.eup %3267 }
 0x81f   :  { %v964_v6 = vmul.f32 %v3268_v5, %v3260_v49 }
 0x821   :  { %v957_v8 = vpop.xlane.xlu0 %956  ;;  %v1018_v9 = vpack.c.bf16 %v964_v6, %v964_v6 }
 0x822   :  { %3271 = vrcp.f32 %v957_v8 }
 0x823   :  { %3001 = vmatmul.mubr.msk.bf16.vlgmr.msra.gmra.mxu0 %vm262_vm10, %v1018_v9 }
 0x824   :  { %3012 = vmatprep.mubr.msk.bf16.mxu0 %vm3404_vm5, %v3403_v55 }
 0x825   :  { %v971_v17 = vpop.permute.xlu0 %970 }
 0x826   :  { %v976_v10 = vsel %vm513_vm11, %v971_v17, 0 }
 0x827   :  { %v3270_v11 = vpop.eup %3269  ;;  %2993 = vmatpush3.bf16.msra.mxu1 %v976_v10 }
 0x828   :  { %3004 = vmatprep.subr.bf16.mxu1 %v3403_v55  ;;  %v962_v13 = vmul.f32 %v3270_v11, %v3262_v53 }
 0x82a   :  { %v969_v15 = vpack.c.bf16 %v962_v13, %v962_v13 }
 0x82c   :  { %2995 = vmatmul.mubr.msk.bf16.vlgmr.msra.gmra.mxu1 %vm262_vm10, %v969_v15 }
 0x82d   :  { %3005 = vmatpush3.bf16.msra.mxu1 %v1074_v16  ;;  %3006 = vmatprep.mubr.msk.bf16.mxu1 %vm3404_vm5, %v3403_v55 }
 0x82e   :  { %3016 = vmatprep.subr.bf16.mxu1 %v3403_v55 }
 0x82f   :  { %v3272_v18 = vpop.eup %3271 }
 0x830   :  { %v966_v19 = vmul.f32 %v3272_v18, %v3264_v56 }
 0x832   :  { %v1067_v20 = vpack.c.bf16 %v966_v19, %v966_v19 }
 0x834   :  { %3007 = vmatmul.mubr.msk.bf16.vlgmr.msra.gmra.mxu1 %vm262_vm10, %v1067_v20 }
 0x835   :  { %3020 = vmatprep.mubr.msk.bf16.mxu1 %vm3404_vm5, %v3403_v55  ;;  %3017 = vmatpush3.bf16.msra.mxu1 %v1187_v35 }
 0x836   :  { %3018 = vmatprep.subr.bf16.mxu1 %v3403_v55 }
 0x839   :  { %3019 = vmatpush3.bf16.msra.mxu1 %v1186_v47 }
 0x83a   :  { %3032 = vmatprep.subr.bf16.mxu1 %v3403_v55 }
 0x849   :  { %v960_v21 = vpop.xlane.xlu1 %959 }
 0x84a   :  { %3273 = vrcp.f32 %v960_v21 }
 0x84d   :  { %v1118_v22 = vpop.permute.xlu1 %1117 }
 0x84e   :  { %v1123_v23 = vsel %vm513_vm11, %v1118_v22, 0 }
 0x84f   :  { %3011 = vmatpush3.bf16.msra.mxu0 %v1123_v23 }
 0x850   :  { %3024 = vmatprep.subr.bf16.mxu0 %v3403_v55 }
 0x857   :  { %v3274_v24 = vpop.eup %3273 }
 0x858   :  { %v968_v25 = vmul.f32 %v3274_v24, %v3266_v61 }
 0x85a   :  { %v1116_v26 = vpack.c.bf16 %v968_v25, %v968_v25 }
 0x85c   :  { %3013 = vmatmul.mubr.msk.bf16.vlgmr.msra.gmra.mxu0 %vm262_vm10, %v1116_v26  ;;  %v1300_v26 = vld [vmem:[%s4142_s11 + $0x10] sm:$0xff] }
 0x85d   :  { %3028 = vmatprep.mubr.msk.bf16.mxu0 %vm3404_vm5, %v3403_v55 }
 0x8e3   :  { %v1061_v27 = vpop.f32.mrf.mxu0 }
 0x8e4   :  { %v3197_v28 = vpack.i.bf16 %v1061_v27, %v3677_v63  ;;  %v1301_v27 = vld [vmem:[%s4142_s11 + $0x18] sm:$0xff] }
 0x8e5   :  { %v3002_v29 = vpop.f32.mrf.mxu0 }
 0x8e6   :  { %3198 = vrot.lane.b32.xlu0 %v3197_v28, %s4150_s22  ;;  %v1298_v28 = vld [vmem:[%s4142_s11] sm:$0xff]  ;;  %v1305_v29 = vpack.c.bf16 %v1301_v27, %v1300_v26 }
 0x8e7   :  { %v1064_v30 = vpop.f32.mrf.mxu0 }
 0x8e8   :  { %v1299_v30 = vld [vmem:[%s4142_s11 + $0x8] sm:$0xff]  ;;  %3025 = vmatpush3.bf16.msra.mxu0 %v1305_v29 }
 0x8e9   :  { %v3003_v31 = vpop.f32.mrf.mxu0  ;;  %3026 = vmatprep.subr.bf16.mxu0 %v3403_v55 }
 0x8ea   :  { %v1304_v31 = vpack.c.bf16 %v1299_v30, %v1298_v28 }
 0x8ec   :  { %v1012_v32 = vpop.f32.mrf.mxu1  ;;  %3027 = vmatpush3.bf16.msra.mxu0 %v1304_v31 }
 0x8ed   :  { %3044 = vmatprep.subr.bf16.mxu0 %v3403_v55 }
 0x8ee   :  { %v2996_v37 = vpop.f32.mrf.mxu1 }
 0x8f0   :  { %v1015_v38 = vpop.f32.mrf.mxu1 }
 0x8f2   :  { %v2997_v63 = vpop.f32.mrf.mxu1 }
 0x8f4   :  { %v1110_v39 = vpop.f32.mrf.mxu1 }
 0x8f5   :  { %v3202_v41 = vpack.i.bf16 %v1110_v39, %v3683_v12 }
 0x8f6   :  { %v3008_v42 = vpop.f32.mrf.mxu1 }
 0x8f7   :  { %3203 = vrot.lane.b32.xlu1 %v3202_v41, %s4149_s28 }
 0x8f8   :  { %v1113_v43 = vpop.f32.mrf.mxu1 }
 0x8fa   :  { %v3009_v44 = vpop.f32.mrf.mxu1 }
 0x91c   :  { %v1159_v48 = vpop.f32.mrf.mxu0 }
 0x91d   :  { %v3207_v12 = vpack.i.bf16 %v1159_v48, %v3681_v7 }
 0x91e   :  { %v3014_v49 = vpop.f32.mrf.mxu0 }
 0x91f   :  { %3208 = vrot.lane.b32.xlu0 %v3207_v12, %s4148_s0 }
 0x920   :  { %v1162_v50 = vpop.f32.mrf.mxu0 }
 0x922   :  { %v3015_v51 = vpop.f32.mrf.mxu0 }
 0x923   :  { %v2759_v51 = vld [vmem:[%s4140_s9] ss:$0 sm:$0xff] }
 0x958   :  { %v3199_v52 = vpop.permute.xlu0 %3198 }
 0x959   :  { %v3201_v54 = vunpack.i.h.bf16 %v3199_v52  ;;  %v3200_v56 = vunpack.i.l.bf16 %v3199_v52 }
 0x95b   :  { %v716_v60 = vsel %vm262_vm10, %v3679_v0, %v3200_v56  ;;  %v1177_v7 = vsel %vm262_vm10, %v1012_v32, %v3201_v54  ;;  %v2757_v0 = vld [vmem:[%s4139_s8] ss:$0 sm:$0xff]  ;;  %v1364_v32 = vld [vmem:[%s4144_s13 + $0x30] sm:$0xff] }
 0x95c   :  { %v1371_v34 = vpack.c.bf16 %v1365_v33, %v1364_v32 }
 0x969   :  { %v3204_v53 = vpop.permute.xlu1 %3203 }
 0x96a   :  { %v3206_v57 = vunpack.i.h.bf16 %v3204_v53  ;;  %v3205_v58 = vunpack.i.l.bf16 %v3204_v53 }
 0x96c   :  { %v1178_v1 = vsel %vm717_vm12, %v1177_v7, %v3206_v57  ;;  %v718_v2 = vsel %vm717_vm12, %v716_v60, %v3205_v58  ;;  %v2760_v58 = vld [vmem:[%s4141_s10] ss:$0 sm:$0xff] }
 0x991   :  { %v3209_v59 = vpop.permute.xlu0 %3208 }
 0x992   :  { %v3211_v61 = vunpack.i.h.bf16 %v3209_v59  ;;  %v3210_v62 = vunpack.i.l.bf16 %v3209_v59 }
 0x994   :  { %v720_v3 = vsel %vm719_vm13, %v718_v2, %v3210_v62  ;;  %v1179_v4 = vsel %vm719_vm13, %v1178_v1, %v3211_v61  ;;  %v1362_v62 = vld [vmem:[%s4144_s13 + $0x20] sm:$0xff]  ;;  %v1363_v1 = vld [vmem:[%s4144_s13 + $0x28] sm:$0xff] }
 0x995   :  { %v1185_v5 = vpack.c.bf16 %v1179_v4, %v720_v3  ;;  %v1370_v2 = vpack.c.bf16 %v1363_v1, %v1362_v62  ;;  %v1360_v3 = vld [vmem:[%s4144_s13 + $0x10] sm:$0xff]  ;;  %v1361_v4 = vld [vmem:[%s4144_s13 + $0x18] sm:$0xff] }
 0x997   :  { %3021 = vmatmul.mubr.msk.bf16.vlgmr.msra.gmra.mxu1 %vm84_vm0, %v1185_v5  ;;  %v1369_v5 = vpack.c.bf16 %v1361_v4, %v1360_v3 }
 0x998   :  { %3040 = vmatprep.mubr.msk.bf16.mxu1 %vm3404_vm5, %v3403_v55  ;;  %3033 = vmatpush3.bf16.msra.mxu1 %v1371_v34 }
 0x999   :  { %3034 = vmatprep.subr.bf16.mxu1 %v3403_v55 }
 0x99c   :  { %3035 = vmatpush3.bf16.msra.mxu1 %v1370_v2 }
 0x99d   :  { %3036 = vmatprep.subr.bf16.mxu1 %v3403_v55 }
 0x9a0   :  { %3037 = vmatpush3.bf16.msra.mxu1 %v1369_v5  ;;  %v2768_v5 = vld [vmem:[%s4135_s4 + $0x1] ss:$0 sm:$0xff] }
 0x9a1   :  { %3038 = vmatprep.subr.bf16.mxu1 %v3403_v55 }
 0xa57   :  { %v1231_v6 = vpop.f32.mrf.mxu1 }
 0xa58   :  { %v1232_v8 = vadd.f32 %v2757_v0, %v1231_v6  ;;  %v1359_v6 = vld [vmem:[%s4144_s13 + $0x8] sm:$0xff] }
 0xa59   :  { %v3022_v9 = vpop.f32.mrf.mxu1 }
 0xa5a   :  { %v3755_v17 = vadd.f32 %v1232_v8, %v3519_v36  ;;  %v2761_v9 = vld [vmem:[%s4143_s12] ss:$0 sm:$0xff] }
 0xa5b   :  { %v1234_v10 = vpop.f32.mrf.mxu1 }
 0xa5c   :  { %v1235_v11 = vadd.f32 %v2757_v0, %v1234_v10  ;;  %v1242_v13 = vsel %vm84_vm0, %v3755_v17, 0.0  ;;  %v1358_v0 = vld [vmem:[%s4144_s13] sm:$0xff] }
 0xa5d   :  { %1243 = vadd.xlane.f32.xlu1 %v1242_v13  ;;  %v3023_v14 = vpop.f32.mrf.mxu1  ;;  %v1368_v8 = vpack.c.bf16 %v1359_v6, %v1358_v0 }
 0xa5e   :  { %v3760_v15 = vadd.f32 %v1235_v11, %v3523_v40 }
 0xa5f   :  { %3039 = vmatpush3.bf16.msra.mxu1 %v1368_v8 }
 0xa60   :  { %v1245_v16 = vsel %vm84_vm0, %v3760_v15, 0.0  ;;  %3058 = vmatprep.subr.bf16.mxu1 %v3403_v55 }
 0xa61   :  { %1246 = vadd.xlane.f32.xlu0 %v1245_v16 }
 0xae6   :  { %v1244_v18 = vpop.xlane.xlu1 %1243 }
 0xae7   :  { %v1248_v19 = vmul.f32 0.03125, %v1244_v18 }
 0xae9   :  { %v1250_v20 = vsub.f32 %v3755_v17, %v1248_v19 }
 0xaea   :  { %v1247_v36 = vpop.xlane.xlu0 %1246 }
 0xaeb   :  { %v1249_v21 = vmul.f32 0.03125, %v1247_v36  ;;  %v1252_v22 = vmul.f32 %v1250_v20, %v1250_v20  ;;  %v1282_v53 = vmul.f32 %v2759_v51, %v1250_v20 }
 0xaed   :  { %v1251_v23 = vsub.f32 %v3760_v15, %v1249_v21  ;;  %v1254_v24 = vsel %vm84_vm0, %v1252_v22, 0.0  ;;  %v2763_v21 = vld [vmem:[#allocation5] ss:$0 sm:$0xff] }
 0xaee   :  { %1255 = vadd.xlane.f32.xlu0 %v1254_v24 }
 0xaef   :  { %v1253_v25 = vmul.f32 %v1251_v23, %v1251_v23  ;;  %v1283_v54 = vmul.f32 %v2759_v51, %v1251_v23 }
 0xaf1   :  { %v1257_v40 = vsel %vm84_vm0, %v1253_v25, 0.0 }
 0xaf2   :  { %1258 = vadd.xlane.f32.xlu0 %v1257_v40 }
 0xb77   :  { %v1256_v35 = vpop.xlane.xlu0 %1255 }
 0xb78   :  { %v1260_v37 = vmul.f32 0.032258064, %v1256_v35 }
 0xb7a   :  { %3275 = vrsqrt.f32 %v1260_v37  ;;  %vm1264_vm14 = vcmp.eq.f32.partialorder %v1260_v37, inf  ;;  %v1267_v42 = vand.u32 2147483648, %v1260_v37  ;;  %vm1266_vm15 = vcmp.eq.f32.partialorder %v1260_v37, 0.0 }
 0xb7b   :  { %v1259_v38 = vpop.xlane.xlu0 %1258 }
 0xb7c   :  { %v1261_v63 = vmul.f32 0.032258064, %v1259_v38 }
 0xb7e   :  { %3277 = vrsqrt.f32 %v1261_v63  ;;  %vm1271_vm1 = vcmp.eq.f32.partialorder %v1261_v63, inf  ;;  %v1274_v48 = vand.u32 2147483648, %v1261_v63  ;;  %vm1273_vm2 = vcmp.eq.f32.partialorder %v1261_v63, 0.0 }
 0xb87   :  { %v3276_v39 = vpop.eup %3275 }
 0xb88   :  { %v1263_v41 = vmul.f32 %v3276_v39, %v1260_v37  ;;  %v2771_v39 = vld [vmem:[%s4136_s5 + $0x30] sm:$0xff] }
 0xb8a   :  { %v1265_v43 = vsel %vm1264_vm14, %v1260_v37, %v1263_v41  ;;  %v2772_v41 = vld [vmem:[%s4136_s5 + $0x38] sm:$0xff] }
 0xb8b   :  { %v3278_v44 = vpop.eup %3277  ;;  %v1268_v45 = vsel %vm1266_vm15, %v1267_v42, %v1265_v43  ;;  %v2769_v42 = vld [vmem:[%s4136_s5 + $0x20] sm:$0xff]  ;;  %v1494_v43 = vpack.c.bf16 %v2772_v41, %v2771_v39 }
 0xb8c   :  { %v1284_v46 = vadd.f32 1e-06, %v1268_v45  ;;  %v1270_v47 = vmul.f32 %v3278_v44, %v1261_v63  ;;  %v2770_v44 = vld [vmem:[%s4136_s5 + $0x28] sm:$0xff] }
 0xb8d   :  { %v1493_v45 = vpack.c.bf16 %v2770_v44, %v2769_v42 }
 0xb8e   :  { %3279 = vrcp.f32 %v1284_v46  ;;  %v1272_v12 = vsel %vm1271_vm1, %v1261_v63, %v1270_v47 }
 0xb8f   :  { %v1275_v49 = vsel %vm1273_vm2, %v1274_v48, %v1272_v12 }
 0xb90   :  { %v1285_v50 = vadd.f32 1e-06, %v1275_v49 }
 0xb92   :  { %3281 = vrcp.f32 %v1285_v50 }
 0xb9b   :  { %v3280_v52 = vpop.eup %3279 }
 0xb9c   :  { %v1287_v56 = vmul.f32 %v3280_v52, %v1282_v53 }
 0xb9e   :  { %v1296_v60 = vadd.f32 %v2760_v58, %v1287_v56 }
 0xb9f   :  { %v3282_v57 = vpop.eup %3281 }
 0xba0   :  { %v1289_v59 = vmul.f32 %v3282_v57, %v1283_v54 }
 0xba2   :  { %v1297_v7 = vadd.f32 %v2760_v58, %v1289_v59 }
 0xba4   :  { %v1303_v61 = vpack.c.bf16 %v1297_v7, %v1296_v60 }
 0xba6   :  { %3029 = vmatmul.mubr.msk.bf16.vlgmr.msra.gmra.mxu0 %vm84_vm0, %v1303_v61  ;;  %v2767_v61 = vld [vmem:[%s4134_s3 + $0x1] ss:$0 sm:$0xff] }
 0xba7   :  { %3048 = vmatprep.mubr.msk.bf16.mxu0 %vm3404_vm5, %v3403_v55  ;;  %3045 = vmatpush3.bf16.msra.mxu0 %v1494_v43 }
 0xba8   :  { %3046 = vmatprep.subr.bf16.mxu0 %v3403_v55 }
 0xbab   :  { %3047 = vmatpush3.bf16.msra.mxu0 %v1493_v45 }
 0xbac   :  { %3052 = vmatprep.subr.bf16.mxu0 %v3403_v55 }
 0xc66   :  { %v1349_v10 = vpop.f32.mrf.mxu0 }
 0xc67   :  { %v1350_v13 = vadd.f32 %v2761_v9, %v1349_v10  ;;  %v2774_v10 = vld [vmem:[%s4137_s6 + $0x1] ss:$0 sm:$0xff] }
 0xc68   :  { %v3030_v11 = vpop.f32.mrf.mxu0 }
 0xc69   :  { %v1356_v19 = vmax.f32 %v1350_v13, 0.0 }
 0xc6a   :  { %v1352_v14 = vpop.f32.mrf.mxu0 }
 0xc6b   :  { %v1353_v16 = vadd.f32 %v2761_v9, %v1352_v14 }
 0xc6c   :  { %v3031_v18 = vpop.f32.mrf.mxu0 }
 0xc6d   :  { %v1357_v20 = vmax.f32 %v1353_v16, 0.0 }
 0xc6f   :  { %v1367_v36 = vpack.c.bf16 %v1357_v20, %v1356_v19 }
 0xc71   :  { %3041 = vmatmul.mubr.msk.bf16.vlgmr.msra.gmra.mxu1 %vm1378_vm3, %v1367_v36 }
 0xc72   :  { %3060 = vmatprep.mubr.msk.bf16.mxu1 %vm3404_vm5, %v3403_v55 }
 0xd31   :  { %v1416_v22 = vpop.f32.mrf.mxu1 }
 0xd32   :  { %v1417_v23 = vadd.f32 %v2763_v21, %v1416_v22 }
 0xd33   :  { %v3042_v24 = vpop.f32.mrf.mxu1 }
 0xd34   :  { %v3826_v25 = vadd.f32 %v1417_v23, %v3755_v17 }
 0xd35   :  { %v1419_v40 = vpop.f32.mrf.mxu1 }
 0xd36   :  { %v1420_v26 = vadd.f32 %v2763_v21, %v1419_v40  ;;  %v1429_v27 = vsel %vm84_vm0, %v3826_v25, 0.0 }
 0xd37   :  { %1430 = vadd.xlane.f32.xlu1 %v1429_v27  ;;  %v3043_v28 = vpop.f32.mrf.mxu1 }
 0xd38   :  { %v3831_v29 = vadd.f32 %v1420_v26, %v3760_v15 }
 0xd3a   :  { %v1432_v30 = vsel %vm84_vm0, %v3831_v29, 0.0 }
 0xd3b   :  { %1433 = vadd.xlane.f32.xlu0 %v1432_v30 }
 0xdc0   :  { %v1431_v31 = vpop.xlane.xlu1 %1430 }
 0xdc1   :  { %v1435_v32 = vmul.f32 0.03125, %v1431_v31 }
 0xdc3   :  { %v1437_v33 = vsub.f32 %v3826_v25, %v1435_v32 }
 0xdc4   :  { %v1434_v17 = vpop.xlane.xlu0 %1433 }
 0xdc5   :  { %v1436_v34 = vmul.f32 0.03125, %v1434_v17  ;;  %v1439_v35 = vmul.f32 %v1437_v33, %v1437_v33  ;;  %v1469_v1 = vmul.f32 %v2767_v61, %v1437_v33 }
 0xdc7   :  { %v1438_v37 = vsub.f32 %v3831_v29, %v1436_v34  ;;  %v1441_v38 = vsel %vm84_vm0, %v1439_v35, 0.0 }
 0xdc8   :  { %1442 = vadd.xlane.f32.xlu1 %v1441_v38 }
 0xdc9   :  { %v1440_v63 = vmul.f32 %v1438_v37, %v1438_v37  ;;  %v1470_v2 = vmul.f32 %v2767_v61, %v1438_v37 }
 0xdcb   :  { %v1444_v15 = vsel %vm84_vm0, %v1440_v63, 0.0 }
 0xdcc   :  { %1445 = vadd.xlane.f32.xlu0 %v1444_v15 }
 0xe51   :  { %v1443_v46 = vpop.xlane.xlu1 %1442 }
 0xe52   :  { %v1447_v47 = vmul.f32 0.032258064, %v1443_v46 }
 0xe54   :  { %3283 = vrsqrt.f32 %v1447_v47  ;;  %vm1451_vm4 = vcmp.eq.f32.partialorder %v1447_v47, inf  ;;  %v1454_v51 = vand.u32 2147483648, %v1447_v47  ;;  %vm1453_vm6 = vcmp.eq.f32.partialorder %v1447_v47, 0.0 }
 0xe55   :  { %v1446_v48 = vpop.xlane.xlu0 %1445 }
 0xe56   :  { %v1448_v12 = vmul.f32 0.032258064, %v1446_v48 }
 0xe58   :  { %3285 = vrsqrt.f32 %v1448_v12  ;;  %vm1458_vm7 = vcmp.eq.f32.partialorder %v1448_v12, inf  ;;  %v1461_v58 = vand.u32 2147483648, %v1448_v12  ;;  %vm1460_vm8 = vcmp.eq.f32.partialorder %v1448_v12, 0.0 }
 0xe61   :  { %v3284_v49 = vpop.eup %3283 }
 0xe62   :  { %v1450_v50 = vmul.f32 %v3284_v49, %v1447_v47 }
 0xe64   :  { %v1452_v52 = vsel %vm1451_vm4, %v1447_v47, %v1450_v50 }
 0xe65   :  { %v3286_v53 = vpop.eup %3285  ;;  %v1455_v54 = vsel %vm1453_vm6, %v1454_v51, %v1452_v52 }
 0xe66   :  { %v1471_v56 = vadd.f32 1e-06, %v1455_v54  ;;  %v1457_v57 = vmul.f32 %v3286_v53, %v1448_v12 }
 0xe68   :  { %3287 = vrcp.f32 %v1471_v56  ;;  %v1459_v59 = vsel %vm1458_vm7, %v1448_v12, %v1457_v57 }
 0xe69   :  { %v1462_v60 = vsel %vm1460_vm8, %v1461_v58, %v1459_v59 }
 0xe6a   :  { %v1472_v7 = vadd.f32 1e-06, %v1462_v60 }
 0xe6c   :  { %3289 = vrcp.f32 %v1472_v7 }
 0xe75   :  { %v3288_v62 = vpop.eup %3287 }
 0xe76   :  { %v1474_v3 = vmul.f32 %v3288_v62, %v1469_v1 }
 0xe78   :  { %v1483_v6 = vadd.f32 %v2768_v5, %v1474_v3 }
 0xe79   :  { %v3290_v4 = vpop.eup %3289 }
 0xe7a   :  { %v1476_v0 = vmul.f32 %v3290_v4, %v1470_v2 }
 0xe7c   :  { %v1484_v8 = vadd.f32 %v2768_v5, %v1476_v0 }
 0xe7e   :  { %v1492_v9 = vpack.c.bf16 %v1484_v8, %v1483_v6 }
 0xe80   :  { %3049 = vmatmul.mubr.msk.bf16.vlgmr.msra.gmra.mxu0 %vm84_vm0, %v1492_v9 }
 0xe81   :  { %3054 = vmatprep.mubr.msk.bf16.mxu0 %vm3404_vm5, %v3403_v55 }
 0xf40   :  { %v1538_v11 = vpop.f32.mrf.mxu0 }
 0xf41   :  { %v1539_v13 = vadd.f32 %v2774_v10, %v1538_v11 }
 0xf42   :  { %v3050_v14 = vpop.f32.mrf.mxu0 }
 0xf43   :  { %v3865_v16 = vpack.c.bf16 %v1539_v13, %v1539_v13 }
 0xf44   :  { %v1541_v18 = vpop.f32.mrf.mxu0 }
 0xf45   :  { %v3867_v19 = vadd.f32 %v2774_v10, %v1541_v18  ;;  %1597 = vrot.lane.b32.xlu0 %v3865_v16, %s3405_s17  ;;  %1547 = vrot.lane.b32.xlu1 %v3865_v16, %s3406_s18 }
 0xf46   :  { %v3051_v20 = vpop.f32.mrf.mxu0 }
 0xf47   :  { %v3923_v10 = vpack.c.bf16 %v3867_v19, %v3867_v19 }
 0xf49   :  { %1645 = vrot.lane.b32.xlu0 %v3865_v16, %s3411_s23  ;;  %1647 = vrot.lane.b32.xlu1 %v3865_v16, %s3407_s1 }
 0xf4d   :  { %1595 = vrot.lane.b32.xlu1 %v3865_v16, %s3409_s19 }
 0xf51   :  { %1697 = vrot.lane.b32.xlu1 %v3865_v16, %s3408_s2 }
 0xf55   :  { %1695 = vrot.lane.b32.xlu1 %v3865_v16, %s3410_s20 }
 0xfb7   :  { %v1598_v36 = vpop.permute.xlu0 %1597  ;;  %v1548_v21 = vpop.permute.xlu1 %1547 }
 0xfb8   :  { %v1603_v22 = vsel %vm262_vm10, %v1598_v36, 0  ;;  %v1553_v23 = vsel %vm262_vm10, %v1548_v21, 0 }
 0xfb9   :  { %3053 = vmatpush3.bf16.xpose.msra.mxu0 %v1553_v23  ;;  %3059 = vmatpush3.bf16.xpose.msra.mxu1 %v1603_v22 }
 0xfba   :  { %3064 = vmatprep.subr.bf16.mxu0 %v3403_v55  ;;  %3070 = vmatprep.subr.bf16.mxu1 %v3403_v55 }
 0xfbb   :  { %v1648_v24 = vpop.permute.xlu1 %1647  ;;  %v1646_v30 = vpop.permute.xlu0 %1645 }
 0xfbc   :  { %v1653_v26 = vsel %vm262_vm10, %v1648_v24, 0 }
 0xfbf   :  { %v1596_v40 = vpop.permute.xlu1 %1595 }
 0xfc0   :  { %3055 = vmatmul.mubr.msk.bf16.vlgmr.msra.gmra.mxu0 %vm262_vm10, %v3865_v16  ;;  %3061 = vmatmul.mubr.msk.bf16.vlgmr.msra.gmra.mxu1 %vm262_vm10, %v1596_v40 }
 0xfc1   :  { %3065 = vmatpush3.bf16.xpose.msra.mxu0 %v1653_v26  ;;  %3066 = vmatprep.mubr.msk.bf16.mxu0 %vm3404_vm5, %v3403_v55 }
 0xfc2   :  { %3072 = vmatprep.mubr.msk.bf16.mxu1 %vm3404_vm5, %v3403_v55  ;;  %3076 = vmatprep.subr.bf16.mxu0 %v3403_v55 }
 0xfc3   :  { %v1698_v27 = vpop.permute.xlu1 %1697 }
 0xfc4   :  { %v1703_v28 = vsel %vm262_vm10, %v1698_v27, 0 }
 0xfc5   :  { %3071 = vmatpush3.bf16.xpose.msra.mxu1 %v1703_v28 }
 0xfc6   :  { %3082 = vmatprep.subr.bf16.mxu1 %v3403_v55 }
 0xfc7   :  { %v1696_v31 = vpop.permute.xlu1 %1695 }
 0xfc8   :  { %3067 = vmatmul.mubr.msk.bf16.vlgmr.msra.gmra.mxu0 %vm262_vm10, %v1646_v30 }
 0xfc9   :  { %3078 = vmatprep.mubr.msk.bf16.mxu0 %vm3404_vm5, %v3403_v55 }
 0xfcc   :  { %3073 = vmatmul.mubr.msk.bf16.vlgmr.msra.gmra.mxu1 %vm262_vm10, %v1696_v31 }
 0xfcd   :  { %3084 = vmatprep.mubr.msk.bf16.mxu1 %vm3404_vm5, %v3403_v55 }
0x1080   :  { %v1589_v32 = vpop.f32.mrf.mxu0  ;;  %v1639_v33 = vpop.f32.mrf.mxu1 }
0x1081   :  { %v1745_v17 = vmul.f32 0.35355338, %v1589_v32  ;;  %v1746_v34 = vmul.f32 0.35355338, %v1639_v33 }
0x1082   :  { %v3056_v35 = vpop.f32.mrf.mxu0  ;;  %v3062_v37 = vpop.f32.mrf.mxu1 }
0x1083   :  { %v1749_v38 = vsel %vm262_vm10, %v1745_v17, -inf  ;;  %v1752_v63 = vsel %vm262_vm10, %v1746_v34, -inf }
0x1084   :  { %1750 = vmax.xlane.f32.xlu0 %v1749_v38  ;;  %v1592_v15 = vpop.f32.mrf.mxu0  ;;  %1753 = vmax.xlane.f32.xlu1 %v1752_v63  ;;  %v1642_v39 = vpop.f32.mrf.mxu1 }
0x1086   :  { %v3057_v41 = vpop.f32.mrf.mxu0  ;;  %v3063_v42 = vpop.f32.mrf.mxu1 }
0x1088   :  { %v1689_v43 = vpop.f32.mrf.mxu0 }
0x1089   :  { %v1747_v44 = vmul.f32 0.35355338, %v1689_v43 }
0x108a   :  { %v3068_v45 = vpop.f32.mrf.mxu0 }
0x108b   :  { %v1755_v46 = vsel %vm262_vm10, %v1747_v44, -inf }
0x108c   :  { %1756 = vmax.xlane.f32.xlu0 %v1755_v46  ;;  %v1692_v47 = vpop.f32.mrf.mxu0  ;;  %v1739_v48 = vpop.f32.mrf.mxu1 }
0x108d   :  { %v1748_v12 = vmul.f32 0.35355338, %v1739_v48 }
0x108e   :  { %v3069_v49 = vpop.f32.mrf.mxu0  ;;  %v3074_v50 = vpop.f32.mrf.mxu1 }
0x108f   :  { %v1758_v51 = vsel %vm262_vm10, %v1748_v12, -inf }
0x1090   :  { %1759 = vmax.xlane.f32.xlu0 %v1758_v51  ;;  %v1742_v52 = vpop.f32.mrf.mxu1 }
0x1092   :  { %v3075_v53 = vpop.f32.mrf.mxu1 }
0x1095   :  { %1843 = vrot.lane.b32.xlu1 %v3865_v16, %s3415_s27 }
0x1099   :  { %1892 = vrot.lane.b32.xlu1 %v3865_v16, %s3413_s25 }
0x109d   :  { %1941 = vrot.lane.b32.xlu1 %v3865_v16, %s3414_s26 }
0x110d   :  { %v1751_v54 = vpop.xlane.xlu0 %1750  ;;  %v1754_v56 = vpop.xlane.xlu1 %1753 }
0x110e   :  { %v1761_v57 = vsub.f32 %v1745_v17, %v1751_v54  ;;  %v1762_v58 = vsub.f32 %v1746_v34, %v1754_v56 }
0x1110   :  { %v1765_v59 = vmul.f32 1.442695, %v1761_v57  ;;  %v1767_v60 = vmul.f32 1.442695, %v1762_v58 }
0x1111   :  { %v1844_v7 = vpop.permute.xlu1 %1843 }
0x1112   :  { %3291 = vpow2.f32 %v1765_v59  ;;  %v1849_v61 = vsel %vm513_vm11, %v1844_v7, 0 }
0x1113   :  { %3293 = vpow2.f32 %v1767_v60  ;;  %3083 = vmatpush3.bf16.msra.mxu1 %v1849_v61 }
0x1114   :  { %3094 = vmatprep.subr.bf16.mxu1 %v3403_v55 }
0x1115   :  { %v1757_v62 = vpop.xlane.xlu0 %1756 }
0x1116   :  { %v1763_v11 = vsub.f32 %v1747_v44, %v1757_v62 }
0x1118   :  { %v1769_v13 = vmul.f32 1.442695, %v1763_v11 }
0x1119   :  { %v1760_v1 = vpop.xlane.xlu0 %1759 }
0x111a   :  { %v1764_v2 = vsub.f32 %v1748_v12, %v1760_v1 }
0x111c   :  { %v1771_v3 = vmul.f32 1.442695, %v1764_v2 }
0x111e   :  { %3295 = vpow2.f32 %v1771_v3 }
0x111f   :  { %v3292_v4 = vpop.eup %3291  ;;  %3297 = vpow2.f32 %v1769_v13 }
0x1120   :  { %v3294_v5 = vpop.eup %3293  ;;  %v1773_v0 = vsel %vm262_vm10, %v3292_v4, 0.0 }
0x1121   :  { %v1776_v6 = vsel %vm262_vm10, %v3294_v5, 0.0  ;;  %1774 = vadd.xlane.f32.xlu0 %v1773_v0 }
0x1122   :  { %1777 = vadd.xlane.f32.xlu1 %v1776_v6 }
0x112b   :  { %v3296_v8 = vpop.eup %3295 }
0x112c   :  { %v1782_v9 = vsel %vm262_vm10, %v3296_v8, 0.0  ;;  %v3298_v14 = vpop.eup %3297 }
0x112d   :  { %1783 = vadd.xlane.f32.xlu1 %v1782_v9  ;;  %v1779_v18 = vsel %vm262_vm10, %v3298_v14, 0.0 }
0x1137   :  { %1794 = vrot.lane.b32.xlu0 %v3865_v16, %s3412_s24  ;;  %v1893_v16 = vpop.permute.xlu1 %1892 }
0x1138   :  { %v1898_v31 = vsel %vm513_vm11, %v1893_v16, 0 }
0x113b   :  { %v1942_v19 = vpop.permute.xlu1 %1941 }
0x113c   :  { %v1947_v32 = vsel %vm513_vm11, %v1942_v19, 0 }
0x113e   :  { %2056 = vrot.lane.b32.xlu1 %v3923_v10, %s3405_s17 }
0x1142   :  { %2054 = vrot.lane.b32.xlu1 %v3923_v10, %s3409_s19 }
0x1146   :  { %2104 = vrot.lane.b32.xlu1 %v3923_v10, %s3411_s23  ;;  %s4152_s23 = smov 8  }
0x1156   :  { %1780 = vadd.xlane.f32.xlu0 %v1779_v18 }
0x116c   :  { %2006 = vrot.lane.b32.xlu0 %v3923_v10, %s3406_s18 }
0x1170   :  { %2106 = vrot.lane.b32.xlu0 %v3923_v10, %s3407_s1 }
0x1174   :  { %2156 = vrot.lane.b32.xlu0 %v3923_v10, %s3408_s2 }
0x1178   :  { %2154 = vrot.lane.b32.xlu0 %v3923_v10, %s3410_s20 }
0x11aa   :  { %v1775_v20 = vpop.xlane.xlu0 %1774 }
0x11ab   :  { %v1778_v36 = vpop.xlane.xlu1 %1777  ;;  %3299 = vrcp.f32 %v1775_v20 }
0x11ac   :  { %3301 = vrcp.f32 %v1778_v36 }
0x11ae   :  { %v1795_v21 = vpop.permute.xlu0 %1794 }
0x11af   :  { %v1800_v22 = vsel %vm513_vm11, %v1795_v21, 0 }
0x11b0   :  { %3077 = vmatpush3.bf16.msra.mxu0 %v1800_v22 }
0x11b1   :  { %3088 = vmatprep.subr.bf16.mxu0 %v3403_v55 }
0x11b6   :  { %v1784_v23 = vpop.xlane.xlu1 %1783 }
0x11b7   :  { %3303 = vrcp.f32 %v1784_v23 }
0x11b8   :  { %v3300_v24 = vpop.eup %3299 }
0x11b9   :  { %v3302_v40 = vpop.eup %3301  ;;  %v1786_v26 = vmul.f32 %v3300_v24, %v3292_v4 }
0x11ba   :  { %v1788_v27 = vmul.f32 %v3302_v40, %v3294_v5  ;;  %v2057_v34 = vpop.permute.xlu1 %2056 }
0x11bb   :  { %v1793_v28 = vpack.c.bf16 %v1786_v26, %v1786_v26  ;;  %v2062_v37 = vsel %vm262_vm10, %v2057_v34, 0 }
0x11bc   :  { %v1842_v30 = vpack.c.bf16 %v1788_v27, %v1788_v27 }
0x11bd   :  { %3079 = vmatmul.mubr.msk.bf16.vlgmr.msra.gmra.mxu0 %vm262_vm10, %v1793_v28 }
0x11be   :  { %3085 = vmatmul.mubr.msk.bf16.vlgmr.msra.gmra.mxu1 %vm262_vm10, %v1842_v30  ;;  %3089 = vmatpush3.bf16.msra.mxu0 %v1898_v31  ;;  %v2055_v38 = vpop.permute.xlu1 %2054 }
0x11bf   :  { %3095 = vmatpush3.bf16.msra.mxu1 %v1947_v32  ;;  %3096 = vmatprep.mubr.msk.bf16.mxu1 %vm3404_vm5, %v3403_v55 }
0x11c0   :  { %3106 = vmatprep.subr.bf16.mxu1 %v3403_v55  ;;  %3090 = vmatprep.mubr.msk.bf16.mxu0 %vm3404_vm5, %v3403_v55 }
0x11c1   :  { %3100 = vmatprep.subr.bf16.mxu0 %v3403_v55 }
0x11c2   :  { %v2105_v12 = vpop.permute.xlu1 %2104 }
0x11c4   :  { %v3304_v33 = vpop.eup %3303 }
0x11c5   :  { %v1792_v17 = vmul.f32 %v3304_v33, %v3296_v8 }
0x11c7   :  { %v1940_v35 = vpack.c.bf16 %v1792_v17, %v1792_v17 }
0x11c9   :  { %3097 = vmatmul.mubr.msk.bf16.vlgmr.msra.gmra.mxu1 %vm262_vm10, %v1940_v35 }
0x11ca   :  { %3107 = vmatpush3.bf16.xpose.msra.mxu1 %v2062_v37  ;;  %3108 = vmatprep.mubr.msk.bf16.mxu1 %vm3404_vm5, %v3403_v55 }
0x11cb   :  { %3118 = vmatprep.subr.bf16.mxu1 %v3403_v55 }
0x11d1   :  { %3109 = vmatmul.mubr.msk.bf16.vlgmr.msra.gmra.mxu1 %vm262_vm10, %v2055_v38 }
0x11d2   :  { %3120 = vmatprep.mubr.msk.bf16.mxu1 %vm3404_vm5, %v3403_v55 }
0x11df   :  { %v1781_v63 = vpop.xlane.xlu0 %1780 }
0x11e0   :  { %3305 = vrcp.f32 %v1781_v63 }
0x11e3   :  { %v2007_v15 = vpop.permute.xlu0 %2006 }
0x11e4   :  { %v2012_v46 = vsel %vm262_vm10, %v2007_v15, 0 }
0x11e7   :  { %v2107_v39 = vpop.permute.xlu0 %2106 }
0x11e8   :  { %v2112_v48 = vsel %vm262_vm10, %v2107_v39, 0 }
0x11eb   :  { %v2157_v41 = vpop.permute.xlu0 %2156 }
0x11ec   :  { %v2162_v42 = vsel %vm262_vm10, %v2157_v41, 0 }
0x11ed   :  { %v3306_v43 = vpop.eup %3305  ;;  %3119 = vmatpush3.bf16.xpose.msra.mxu1 %v2162_v42 }
0x11ee   :  { %v1790_v44 = vmul.f32 %v3306_v43, %v3298_v14  ;;  %3130 = vmatprep.subr.bf16.mxu1 %v3403_v55 }
0x11ef   :  { %v2155_v47 = vpop.permute.xlu0 %2154 }
0x11f0   :  { %v1891_v45 = vpack.c.bf16 %v1790_v44, %v1790_v44 }
0x11f2   :  { %3091 = vmatmul.mubr.msk.bf16.vlgmr.msra.gmra.mxu0 %vm262_vm10, %v1891_v45 }
0x11f3   :  { %3101 = vmatpush3.bf16.xpose.msra.mxu0 %v2012_v46  ;;  %3102 = vmatprep.mubr.msk.bf16.mxu0 %vm3404_vm5, %v3403_v55 }
0x11f4   :  { %3121 = vmatmul.mubr.msk.bf16.vlgmr.msra.gmra.mxu1 %vm262_vm10, %v2155_v47  ;;  %3112 = vmatprep.subr.bf16.mxu0 %v3403_v55 }
0x11f5   :  { %3132 = vmatprep.mubr.msk.bf16.mxu1 %vm3404_vm5, %v3403_v55 }
0x11fa   :  { %3103 = vmatmul.mubr.msk.bf16.vlgmr.msra.gmra.mxu0 %vm262_vm10, %v3923_v10 }
0x11fb   :  { %3113 = vmatpush3.bf16.xpose.msra.mxu0 %v2112_v48  ;;  %3114 = vmatprep.mubr.msk.bf16.mxu0 %vm3404_vm5, %v3403_v55 }
0x11fc   :  { %3124 = vmatprep.subr.bf16.mxu0 %v3403_v55 }
0x1202   :  { %3115 = vmatmul.mubr.msk.bf16.vlgmr.msra.gmra.mxu0 %vm262_vm10, %v2105_v12 }
0x1203   :  { %3126 = vmatprep.mubr.msk.bf16.mxu0 %vm3404_vm5, %v3403_v55 }
0x127d   :  { %v3979_v49 = vpop.f32.mrf.mxu0 }
0x127e   :  { %v3981_v50 = vpop.f32.mrf.mxu1 }
0x127f   :  { %v3080_v51 = vpop.f32.mrf.mxu0 }
0x1280   :  { %v3086_v52 = vpop.f32.mrf.mxu1 }
0x1281   :  { %v1839_v53 = vpop.f32.mrf.mxu0 }
0x1282   :  { %v1888_v54 = vpop.f32.mrf.mxu1 }
0x1283   :  { %v3081_v56 = vpop.f32.mrf.mxu0 }
0x1284   :  { %v3087_v57 = vpop.f32.mrf.mxu1 }
0x1289   :  { %v3983_v58 = vpop.f32.mrf.mxu1 }
0x128b   :  { %v3098_v59 = vpop.f32.mrf.mxu1 }
0x128d   :  { %v1986_v60 = vpop.f32.mrf.mxu1 }
0x128f   :  { %v3099_v7 = vpop.f32.mrf.mxu1 }
0x1291   :  { %v2098_v61 = vpop.f32.mrf.mxu1 }
0x1292   :  { %v2205_v62 = vmul.f32 0.35355338, %v2098_v61 }
0x1293   :  { %v3110_v1 = vpop.f32.mrf.mxu1 }
0x1294   :  { %v2211_v2 = vsel %vm262_vm10, %v2205_v62, -inf }
0x1295   :  { %2212 = vmax.xlane.f32.xlu0 %v2211_v2  ;;  %v2101_v3 = vpop.f32.mrf.mxu1 }
0x1297   :  { %v3111_v4 = vpop.f32.mrf.mxu1 }
0x12b2   :  { %v3986_v5 = vpop.f32.mrf.mxu0 }
0x12b4   :  { %v3092_v0 = vpop.f32.mrf.mxu0  ;;  %v2198_v6 = vpop.f32.mrf.mxu1 }
0x12b5   :  { %v2207_v40 = vmul.f32 0.35355338, %v2198_v6 }
0x12b6   :  { %v1937_v8 = vpop.f32.mrf.mxu0  ;;  %v3122_v9 = vpop.f32.mrf.mxu1 }
0x12b7   :  { %v2217_v30 = vsel %vm262_vm10, %v2207_v40, -inf }
0x12b8   :  { %v3093_v11 = vpop.f32.mrf.mxu0  ;;  %v2201_v13 = vpop.f32.mrf.mxu1 }
0x12ba   :  { %v2048_v14 = vpop.f32.mrf.mxu0  ;;  %v3123_v18 = vpop.f32.mrf.mxu1 }
0x12bb   :  { %v2204_v16 = vmul.f32 0.35355338, %v2048_v14 }
0x12bc   :  { %v3104_v19 = vpop.f32.mrf.mxu0 }
0x12bd   :  { %v2208_v20 = vsel %vm262_vm10, %v2204_v16, -inf  ;;  %v2795_v19 = vld [vmem:[%s4138_s7 + $0x38] sm:$0xff] }
0x12be   :  { %2209 = vmax.xlane.f32.xlu1 %v2208_v20  ;;  %v2051_v36 = vpop.f32.mrf.mxu0 }
0x12c0   :  { %v3105_v21 = vpop.f32.mrf.mxu0 }
0x12c2   :  { %v2148_v22 = vpop.f32.mrf.mxu0 }
0x12c3   :  { %v2206_v23 = vmul.f32 0.35355338, %v2148_v22 }
0x12c4   :  { %v3116_v24 = vpop.f32.mrf.mxu0 }
0x12c5   :  { %v2214_v26 = vsel %vm262_vm10, %v2206_v23, -inf  ;;  %v2792_v24 = vld [vmem:[%s4138_s7 + $0x20] sm:$0xff] }
0x12c6   :  { %v2151_v27 = vpop.f32.mrf.mxu0  ;;  %2215 = vmax.xlane.f32.xlu0 %v2214_v26 }
0x12c8   :  { %v3117_v28 = vpop.f32.mrf.mxu0 }
0x12ca   :  { %2218 = vmax.xlane.f32.xlu0 %v2217_v30 }
0x12cf   :  { %2253 = vrot.lane.b32.xlu1 %v3923_v10, %s3412_s24  ;;  %s4153_s24 = smov 16  }
0x131e   :  { %v2213_v31 = vpop.xlane.xlu0 %2212 }
0x131f   :  { %v2221_v32 = vsub.f32 %v2205_v62, %v2213_v31 }
0x1321   :  { %v2226_v33 = vmul.f32 1.442695, %v2221_v32 }
0x1323   :  { %3307 = vpow2.f32 %v2226_v33 }
0x1330   :  { %v3308_v17 = vpop.eup %3307 }
0x1331   :  { %v2235_v34 = vsel %vm262_vm10, %v3308_v17, 0.0 }
0x1332   :  { %2236 = vadd.xlane.f32.xlu0 %v2235_v34 }
0x1347   :  { %v2210_v35 = vpop.xlane.xlu1 %2209 }
0x1348   :  { %v2220_v37 = vsub.f32 %v2204_v16, %v2210_v35  ;;  %v2794_v16 = vld [vmem:[%s4138_s7 + $0x30] sm:$0xff] }
0x1349   :  { %v2472_v36 = vpack.c.bf16 %v2795_v19, %v2794_v16  ;;  %v2806_v16 = vld [vmem:[%s4142_s11 + $0x38] sm:$0xff]  ;;  %v2803_v19 = vld [vmem:[%s4142_s11 + $0x20] sm:$0xff] }
0x134a   :  { %v2224_v38 = vmul.f32 1.442695, %v2220_v37 }
0x134b   :  { %v2254_v63 = vpop.permute.xlu1 %2253 }
0x134c   :  { %3309 = vpow2.f32 %v2224_v38  ;;  %v2259_v15 = vsel %vm513_vm11, %v2254_v63, 0 }
0x134d   :  { %3125 = vmatpush3.bf16.msra.mxu0 %v2259_v15 }
0x134e   :  { %3136 = vmatprep.subr.bf16.mxu0 %v3403_v55 }
0x134f   :  { %v2216_v39 = vpop.xlane.xlu0 %2215 }
0x1350   :  { %v2222_v41 = vsub.f32 %v2206_v23, %v2216_v39 }
0x1352   :  { %v2228_v42 = vmul.f32 1.442695, %v2222_v41 }
0x1353   :  { %v2219_v43 = vpop.xlane.xlu0 %2218 }
0x1354   :  { %3311 = vpow2.f32 %v2228_v42  ;;  %v2223_v44 = vsub.f32 %v2207_v40, %v2219_v43  ;;  %v2793_v40 = vld [vmem:[%s4138_s7 + $0x28] sm:$0xff]  ;;  %s4154_s7 = smov 24  }
0x1355   :  { %v2471_v28 = vpack.c.bf16 %v2793_v40, %v2792_v24 }
0x1356   :  { %v2230_v45 = vmul.f32 1.442695, %v2223_v44 }
0x1358   :  { %3313 = vpow2.f32 %v2230_v45 }
0x1359   :  { %v3310_v46 = vpop.eup %3309 }
0x135a   :  { %v2232_v47 = vsel %vm262_vm10, %v3310_v46, 0.0 }
0x135b   :  { %2233 = vadd.xlane.f32.xlu1 %v2232_v47 }
0x1361   :  { %v3312_v48 = vpop.eup %3311 }
0x1362   :  { %v2238_v12 = vsel %vm262_vm10, %v3312_v48, 0.0 }
0x1363   :  { %2239 = vadd.xlane.f32.xlu1 %v2238_v12 }
0x1365   :  { %v3314_v51 = vpop.eup %3313 }
0x1366   :  { %v2241_v52 = vsel %vm262_vm10, %v3314_v51, 0.0 }
0x1367   :  { %2242 = vadd.xlane.f32.xlu0 %v2241_v52 }
0x1374   :  { %2351 = vrot.lane.b32.xlu1 %v3923_v10, %s3413_s25 }
0x1378   :  { %2400 = vrot.lane.b32.xlu1 %v3923_v10, %s3414_s26 }
0x137d   :  { %2302 = vrot.lane.b32.xlu0 %v3923_v10, %s3415_s27 }
0x13bb   :  { %v2237_v53 = vpop.xlane.xlu0 %2236 }
0x13bc   :  { %3315 = vrcp.f32 %v2237_v53 }
0x13c9   :  { %v3316_v57 = vpop.eup %3315 }
0x13ca   :  { %v2247_v62 = vmul.f32 %v3316_v57, %v3308_v17 }
0x13cc   :  { %v2301_v0 = vpack.c.bf16 %v2247_v62, %v2247_v62 }
0x13e4   :  { %v2234_v54 = vpop.xlane.xlu1 %2233 }
0x13e5   :  { %3317 = vrcp.f32 %v2234_v54 }
0x13ec   :  { %v2240_v56 = vpop.xlane.xlu1 %2239 }
0x13ed   :  { %3319 = vrcp.f32 %v2240_v56 }
0x13f0   :  { %v2352_v59 = vpop.permute.xlu1 %2351  ;;  %v2243_v60 = vpop.xlane.xlu0 %2242 }
0x13f1   :  { %3321 = vrcp.f32 %v2243_v60  ;;  %v2357_v10 = vsel %vm513_vm11, %v2352_v59, 0 }
0x13f2   :  { %v3318_v7 = vpop.eup %3317 }
0x13f3   :  { %v2245_v61 = vmul.f32 %v3318_v7, %v3310_v46 }
0x13f4   :  { %v2303_v1 = vpop.permute.xlu0 %2302  ;;  %v2401_v4 = vpop.permute.xlu1 %2400 }
0x13f5   :  { %v2308_v2 = vsel %vm513_vm11, %v2303_v1, 0  ;;  %v2252_v3 = vpack.c.bf16 %v2245_v61, %v2245_v61  ;;  %v2406_v6 = vsel %vm513_vm11, %v2401_v4, 0 }
0x13f6   :  { %3131 = vmatpush3.bf16.msra.mxu1 %v2308_v2 }
0x13f7   :  { %3127 = vmatmul.mubr.msk.bf16.vlgmr.msra.gmra.mxu0 %vm262_vm10, %v2252_v3  ;;  %3142 = vmatprep.subr.bf16.mxu1 %v3403_v55 }
0x13f8   :  { %3137 = vmatpush3.bf16.msra.mxu0 %v2357_v10  ;;  %3138 = vmatprep.mubr.msk.bf16.mxu0 %vm3404_vm5, %v3403_v55 }
0x13f9   :  { %3133 = vmatmul.mubr.msk.bf16.vlgmr.msra.gmra.mxu1 %vm262_vm10, %v2301_v0  ;;  %3148 = vmatprep.subr.bf16.mxu0 %v3403_v55 }
0x13fa   :  { %v3320_v8 = vpop.eup %3319  ;;  %3143 = vmatpush3.bf16.msra.mxu1 %v2406_v6  ;;  %3144 = vmatprep.mubr.msk.bf16.mxu1 %vm3404_vm5, %v3403_v55 }
0x13fb   :  { %v2249_v9 = vmul.f32 %v3320_v8, %v3312_v48  ;;  %3156 = vmatprep.subr.bf16.mxu1 %v3403_v55 }
0x13fd   :  { %v2350_v11 = vpack.c.bf16 %v2249_v9, %v2249_v9 }
0x13fe   :  { %v3322_v13 = vpop.eup %3321 }
0x13ff   :  { %3139 = vmatmul.mubr.msk.bf16.vlgmr.msra.gmra.mxu0 %vm262_vm10, %v2350_v11  ;;  %v2251_v14 = vmul.f32 %v3322_v13, %v3314_v51 }
0x1400   :  { %3152 = vmatprep.mubr.msk.bf16.mxu0 %vm3404_vm5, %v3403_v55  ;;  %3149 = vmatpush3.bf16.msra.mxu0 %v2472_v36  ;;  %v2804_v36 = vld [vmem:[%s4142_s11 + $0x28] sm:$0xff] }
0x1401   :  { %v2399_v18 = vpack.c.bf16 %v2251_v14, %v2251_v14  ;;  %3150 = vmatprep.subr.bf16.mxu0 %v3403_v55 }
0x1403   :  { %3145 = vmatmul.mubr.msk.bf16.vlgmr.msra.gmra.mxu1 %vm262_vm10, %v2399_v18  ;;  %v2805_v18 = vld [vmem:[%s4142_s11 + $0x30] sm:$0xff] }
0x1404   :  { %3160 = vmatprep.mubr.msk.bf16.mxu1 %vm3404_vm5, %v3403_v55  ;;  %3151 = vmatpush3.bf16.msra.mxu0 %v2471_v28 }
0x1405   :  { %3164 = vmatprep.subr.bf16.mxu0 %v3403_v55 }
0x14b7   :  { %v2295_v20 = vpop.f32.mrf.mxu0 }
0x14b9   :  { %v3128_v21 = vpop.f32.mrf.mxu0  ;;  %v2344_v22 = vpop.f32.mrf.mxu1 }
0x14ba   :  { %v3212_v23 = vpack.i.bf16 %v2344_v22, %v3981_v50  ;;  %v2593_v21 = vpack.c.bf16 %v2804_v36, %v2803_v19  ;;  %v2816_v22 = vld [vmem:[%s4144_s13 + $0x70] sm:$0xff] }
0x14bb   :  { %v2298_v26 = vpop.f32.mrf.mxu0  ;;  %v3134_v27 = vpop.f32.mrf.mxu1 }
0x14bc   :  { %3213 = vrot.lane.b32.xlu1 %v3212_v23, %s4152_s23  ;;  %v2817_v23 = vld [vmem:[%s4144_s13 + $0x78] sm:$0xff] }
0x14bd   :  { %v3129_v30 = vpop.f32.mrf.mxu0  ;;  %v2347_v31 = vpop.f32.mrf.mxu1  ;;  %v2662_v24 = vpack.c.bf16 %v2817_v23, %v2816_v22 }
0x14bf   :  { %v3135_v50 = vpop.f32.mrf.mxu1  ;;  %v2393_v32 = vpop.f32.mrf.mxu0 }
0x14c0   :  { %v3217_v33 = vpack.i.bf16 %v2393_v32, %v3986_v5 }
0x14c1   :  { %v3140_v17 = vpop.f32.mrf.mxu0 }
0x14c2   :  { %3218 = vrot.lane.b32.xlu0 %v3217_v33, %s4153_s24 }
0x14c3   :  { %v2396_v34 = vpop.f32.mrf.mxu0  ;;  %v2442_v35 = vpop.f32.mrf.mxu1 }
0x14c4   :  { %v3222_v37 = vpack.i.bf16 %v2442_v35, %v3983_v58 }
0x14c5   :  { %v3141_v38 = vpop.f32.mrf.mxu0  ;;  %v3146_v63 = vpop.f32.mrf.mxu1 }
0x14c6   :  { %3223 = vrot.lane.b32.xlu1 %v3222_v37, %s4154_s7 }
0x14c7   :  { %v2445_v15 = vpop.f32.mrf.mxu1 }
0x14c9   :  { %v3147_v39 = vpop.f32.mrf.mxu1 }
0x14ca   :  { %v2801_v39 = vld [vmem:[%s4140_s9 + $0x1] ss:$0 sm:$0xff] }
0x152e   :  { %v3214_v41 = vpop.permute.xlu1 %3213 }
0x152f   :  { %v3216_v43 = vunpack.i.h.bf16 %v3214_v41  ;;  %v3215_v44 = vunpack.i.l.bf16 %v3214_v41 }
0x1531   :  { %v2460_v47 = vsel %vm262_vm10, %v2295_v20, %v3216_v43  ;;  %v2001_v48 = vsel %vm262_vm10, %v3979_v49, %v3215_v44  ;;  %v2797_v49 = vld [vmem:[%s4139_s8 + $0x1] ss:$0 sm:$0xff]  ;;  %v2594_v20 = vpack.c.bf16 %v2806_v16, %v2805_v18 }
0x1533   :  { %3157 = vmatpush3.bf16.msra.mxu1 %v2594_v20 }
0x1534   :  { %v3219_v42 = vpop.permute.xlu0 %3218  ;;  %3158 = vmatprep.subr.bf16.mxu1 %v3403_v55 }
0x1535   :  { %v3221_v45 = vunpack.i.h.bf16 %v3219_v42  ;;  %v3220_v46 = vunpack.i.l.bf16 %v3219_v42 }
0x1537   :  { %v2002_v51 = vsel %vm717_vm12, %v2001_v48, %v3220_v46  ;;  %v2461_v52 = vsel %vm717_vm12, %v2460_v47, %v3221_v45  ;;  %3159 = vmatpush3.bf16.msra.mxu1 %v2593_v21  ;;  %v2802_v46 = vld [vmem:[%s4141_s10 + $0x1] ss:$0 sm:$0xff] }
0x1538   :  { %v3224_v5 = vpop.permute.xlu1 %3223 }
0x1539   :  { %v3226_v12 = vunpack.i.h.bf16 %v3224_v5  ;;  %v3225_v58 = vunpack.i.l.bf16 %v3224_v5 }
0x153b   :  { %v2462_v53 = vsel %vm719_vm13, %v2461_v52, %v3226_v12  ;;  %v2003_v54 = vsel %vm719_vm13, %v2002_v51, %v3225_v58  ;;  %v2814_v58 = vld [vmem:[%s4144_s13 + $0x60] sm:$0xff]  ;;  %v2815_v51 = vld [vmem:[%s4144_s13 + $0x68] sm:$0xff] }
0x153c   :  { %v2470_v56 = vpack.c.bf16 %v2462_v53, %v2003_v54  ;;  %v2661_v52 = vpack.c.bf16 %v2815_v51, %v2814_v58  ;;  %v2812_v53 = vld [vmem:[%s4144_s13 + $0x50] sm:$0xff]  ;;  %v2813_v54 = vld [vmem:[%s4144_s13 + $0x58] sm:$0xff] }
0x153e   :  { %3153 = vmatmul.mubr.msk.bf16.vlgmr.msra.gmra.mxu0 %vm84_vm0, %v2470_v56  ;;  %v2660_v56 = vpack.c.bf16 %v2813_v54, %v2812_v53 }
0x153f   :  { %3172 = vmatprep.mubr.msk.bf16.mxu0 %vm3404_vm5, %v3403_v55  ;;  %3165 = vmatpush3.bf16.msra.mxu0 %v2662_v24 }
0x1540   :  { %3166 = vmatprep.subr.bf16.mxu0 %v3403_v55 }
0x1543   :  { %3167 = vmatpush3.bf16.msra.mxu0 %v2661_v52 }
0x1544   :  { %3168 = vmatprep.subr.bf16.mxu0 %v3403_v55 }
0x1547   :  { %3169 = vmatpush3.bf16.msra.mxu0 %v2660_v56 }
0x1548   :  { %3170 = vmatprep.subr.bf16.mxu0 %v3403_v55 }
0x15fe   :  { %v2516_v57 = vpop.f32.mrf.mxu0 }
0x15ff   :  { %v2517_v59 = vadd.f32 %v2797_v49, %v2516_v57  ;;  %v2811_v57 = vld [vmem:[%s4144_s13 + $0x48] sm:$0xff] }
0x1600   :  { %v3154_v60 = vpop.f32.mrf.mxu0 }
0x1601   :  { %v4057_v7 = vadd.f32 %v2517_v59, %v3826_v25  ;;  %v2808_v60 = vld [vmem:[%s4143_s12 + $0x1] ss:$0 sm:$0xff] }
0x1602   :  { %v2519_v61 = vpop.f32.mrf.mxu0 }
0x1603   :  { %v2520_v62 = vadd.f32 %v2797_v49, %v2519_v61  ;;  %v2529_v1 = vsel %vm84_vm0, %v4057_v7, 0.0  ;;  %v2810_v49 = vld [vmem:[%s4144_s13 + $0x40] sm:$0xff]  ;;  %s3417_s13 = smov [#allocation7]  }
0x1604   :  { %2530 = vadd.xlane.f32.xlu0 %v2529_v1  ;;  %v3155_v2 = vpop.f32.mrf.mxu0  ;;  %v2659_v59 = vpack.c.bf16 %v2811_v57, %v2810_v49  ;;  %s2722_s12 = sshll.u32 %s3417_s13, 4  ;;  %s2723_s12 = int_to_ptr.vmem [resolvable:$true] %s2722_s12 }
0x1605   :  { %v4062_v3 = vadd.f32 %v2520_v62, %v3831_v29  ;;  %s3371_s29 = scalar_lea.vmem %s2723_s12, 256  ;;  %p3376_p11 = scmp.lt.s32.totalorder %s2723_s12, %s2723_s12 }
0x1606   :  { %3171 = vmatpush3.bf16.msra.mxu0 %v2659_v59  ;;  %p3372_p10 = scmp.ne.s32.totalorder %s2723_s12, %s3371_s29  ;;  %p3377_p12 = scmp.lt.s32.totalorder %s3371_s29, %s3371_s29 }
0x1607   :  { %v2532_v4 = vsel %vm84_vm0, %v4062_v3, 0.0 }
0x1608   :  { %2533 = vadd.xlane.f32.xlu1 %v2532_v4  ;;  %p3378_p13 = por %p3377_p12, %p3376_p11 }
0x160a   :  { %p3379_p0 = pnand %p3378_p13, %p3372_p10 }
0x168d   :  { %v2531_v10 = vpop.xlane.xlu0 %2530 }
0x168e   :  { %v2535_v0 = vmul.f32 0.03125, %v2531_v10 }
0x1690   :  { %v2537_v6 = vsub.f32 %v4057_v7, %v2535_v0 }
0x1691   :  { %v2534_v25 = vpop.xlane.xlu1 %2533 }
0x1692   :  { %v2536_v8 = vmul.f32 0.03125, %v2534_v25  ;;  %v2539_v9 = vmul.f32 %v2537_v6, %v2537_v6  ;;  %v2569_v42 = vmul.f32 %v2801_v39, %v2537_v6  ;;  %v2818_v25 = vld [vmem:[#allocation5 + $0x1] ss:$0 sm:$0xff] }
0x1694   :  { %v2538_v11 = vsub.f32 %v4062_v3, %v2536_v8  ;;  %v2541_v13 = vsel %vm84_vm0, %v2539_v9, 0.0 }
0x1695   :  { %2542 = vadd.xlane.f32.xlu0 %v2541_v13 }
0x1696   :  { %v2540_v14 = vmul.f32 %v2538_v11, %v2538_v11  ;;  %v2570_v43 = vmul.f32 %v2801_v39, %v2538_v11 }
0x1698   :  { %v2544_v29 = vsel %vm84_vm0, %v2540_v14, 0.0 }
0x1699   :  { %2545 = vadd.xlane.f32.xlu0 %v2544_v29 }
0x171e   :  { %v2543_v40 = vpop.xlane.xlu0 %2542 }
0x171f   :  { %v2547_v26 = vmul.f32 0.032258064, %v2543_v40 }
0x1721   :  { %3323 = vrsqrt.f32 %v2547_v26  ;;  %vm2551_vm5 = vcmp.eq.f32.partialorder %v2547_v26, inf  ;;  %v2554_v50 = vand.u32 2147483648, %v2547_v26  ;;  %vm2553_vm9 = vcmp.eq.f32.partialorder %v2547_v26, 0.0 }
0x1722   :  { %v2546_v27 = vpop.xlane.xlu0 %2545 }
0x1723   :  { %v2548_v28 = vmul.f32 0.032258064, %v2546_v27 }
0x1725   :  { %3325 = vrsqrt.f32 %v2548_v28  ;;  %vm2558_vm10 = vcmp.eq.f32.partialorder %v2548_v28, inf  ;;  %v2561_v37 = vand.u32 2147483648, %v2548_v28  ;;  %vm2560_vm11 = vcmp.eq.f32.partialorder %v2548_v28, 0.0 }
0x172e   :  { %v3324_v30 = vpop.eup %3323 }
0x172f   :  { %v2550_v31 = vmul.f32 %v3324_v30, %v2547_v26 }
0x1731   :  { %v2552_v32 = vsel %vm2551_vm5, %v2547_v26, %v2550_v31 }
0x1732   :  { %v3326_v33 = vpop.eup %3325  ;;  %v2555_v17 = vsel %vm2553_vm9, %v2554_v50, %v2552_v32 }
0x1733   :  { %v2571_v34 = vadd.f32 1e-06, %v2555_v17  ;;  %v2557_v35 = vmul.f32 %v3326_v33, %v2548_v28 }
0x1735   :  { %3327 = vrcp.f32 %v2571_v34  ;;  %v2559_v38 = vsel %vm2558_vm10, %v2548_v28, %v2557_v35 }
0x1736   :  { %v2562_v63 = vsel %vm2560_vm11, %v2561_v37, %v2559_v38 }
0x1737   :  { %v2572_v15 = vadd.f32 1e-06, %v2562_v63 }
0x1739   :  { %3329 = vrcp.f32 %v2572_v15 }
0x1742   :  { %v3328_v41 = vpop.eup %3327 }
0x1743   :  { %v2574_v44 = vmul.f32 %v3328_v41, %v2569_v42 }
0x1745   :  { %v2583_v47 = vadd.f32 %v2802_v46, %v2574_v44 }
0x1746   :  { %v3330_v45 = vpop.eup %3329 }
0x1747   :  { %v2576_v5 = vmul.f32 %v3330_v45, %v2570_v43 }
0x1749   :  { %v2584_v48 = vadd.f32 %v2802_v46, %v2576_v5 }
0x174b   :  { %v2592_v12 = vpack.c.bf16 %v2584_v48, %v2583_v47 }
0x174d   :  { %3161 = vmatmul.mubr.msk.bf16.vlgmr.msra.gmra.mxu1 %vm84_vm0, %v2592_v12 }
0x180d   :  { %v2638_v61 = vpop.f32.mrf.mxu1 }
0x180e   :  { %v2639_v1 = vadd.f32 %v2808_v60, %v2638_v61 }
0x180f   :  { %v3162_v62 = vpop.f32.mrf.mxu1 }
0x1810   :  { %v2645_v10 = vmax.f32 %v2639_v1, 0.0 }
0x1811   :  { %v2641_v2 = vpop.f32.mrf.mxu1 }
0x1812   :  { %v2642_v4 = vadd.f32 %v2808_v60, %v2641_v2 }
0x1813   :  { %v3163_v55 = vpop.f32.mrf.mxu1 }
0x1814   :  { %v2646_v0 = vmax.f32 %v2642_v4, 0.0 }
0x1816   :  { %v2658_v6 = vpack.c.bf16 %v2646_v0, %v2645_v10 }
0x1818   :  { %3173 = vmatmul.mubr.msk.bf16.vlgmr.msra.gmra.mxu0 %vm1378_vm3, %v2658_v6 }
0x18d8   :  { %v2706_v8 = vpop.f32.mrf.mxu0 }
0x18d9   :  { %v2707_v9 = vadd.f32 %v2818_v25, %v2706_v8 }
0x18da   :  { %v3174_v11 = vpop.f32.mrf.mxu0 }
0x18db   :  { %v2713_v13 = vadd.f32 %v2707_v9, %v4057_v7 }
0x18dc   :  { %v2709_v14 = vpop.f32.mrf.mxu0 }
0x18dd   :  { %2715 = vst.msk [vmem:[#allocation7] sm:$0xff] %vm84_vm0, %v2713_v13  ;;  %v2710_v29 = vadd.f32 %v2818_v25, %v2709_v14 }
0x18de   :  { %v3175_v18 = vpop.f32.mrf.mxu0 }
0x18df   :  { %v2714_v16 = vadd.f32 %v2710_v29, %v4062_v3 }
0x18e1   :  { %2716 = vst.msk [vmem:[#allocation7 + $0x8] sm:$0xff] %vm84_vm0, %v2714_v16 }
0x18e2   :  { %3382 = shalt.err (!%p3379_p0)
}
0x18e3   :  { %s4155_s21 = smov 128  }
0x18e4   :  { %2728 = dma.vmem_to_hbm [thread:$0]  %s2723_s12, 256, %s4146_s15, [#allocation4], %s4155_s21, %s4155_s21, %s4152_s23  }
0x18e5   :  { %3395 = dma.done.wait [#allocation4], 256  }
0x18e6   :  { %3396 = vsyncadd [#allocation4], 4294967040 }
0x18e7   :  { %2732 = vsyncpa [#allocation3], 1 }
0x18e8   :  { %2733 = vsyncpa [#allocation6], 1 }
0x18e9   :  { %2734 = vsyncpa [#allocation4], 1 }

</bundles_post_ra>
